<compile_context>
chip_gen: v5e
topology: v5e:2x2
jax: 0.10.0
libtpu: 0.0.40
codegen_flags: <defaults>
</compile_context>

<pallas_src>
import jax
import jax.numpy as jnp
from jax.experimental import pallas as pl
from jax.experimental.pallas import tpu as pltpu


# ---------------------------------------------------------------------------
# Pallas kernel: one StateVAE path per grid step (fused matmuls + elementwise).
# ---------------------------------------------------------------------------
def _stereo_vae_kernel(vae_idx_ref,                      # scalar prefetch (SMEM)
                       x_ref, eps_ref,
                       w_enc_ref, b_enc_ref,
                       w_mulv_ref, b_mulv_ref,
                       w_d1_ref, b_d1_ref,
                       w_d2_ref, b_d2_ref,
                       recon_ref, mulv_ref):
    del vae_idx_ref  # only used by the index_maps

    x = x_ref[...]                                                    # (B, Din) f32
    z_dim = eps_ref.shape[-1]

    # Encoder: Linear + ReLU (bf16 weights, f32 accumulate on the MXU)
    h = jnp.dot(x.astype(jnp.bfloat16), w_enc_ref[...],
                preferred_element_type=jnp.float32) + b_enc_ref[...]
    h = jnp.maximum(h, 0.0)                                           # (B, Hd)

    # Fused latent heads: one matmul producing [mu | logvar]
    mulv = jnp.dot(h.astype(jnp.bfloat16), w_mulv_ref[...],
                   preferred_element_type=jnp.float32) + b_mulv_ref[...]  # (B, 2Z)
    mu = mulv[:, :z_dim]
    lv = mulv[:, z_dim:]

    # Reparameterization trick (eps supplied from the host RNG)
    z = mu + jnp.exp(0.5 * lv) * eps_ref[...]                         # (B, Z)

    # Decoder: Linear + ReLU -> Linear + Sigmoid
    d1 = jnp.dot(z.astype(jnp.bfloat16), w_d1_ref[...],
                 preferred_element_type=jnp.float32) + b_d1_ref[...]
    d1 = jnp.maximum(d1, 0.0)                                         # (B, Hd)
    logits = jnp.dot(d1.astype(jnp.bfloat16), w_d2_ref[...],
                     preferred_element_type=jnp.float32) + b_d2_ref[...]  # (B, Din)

    recon_ref[...] = jax.nn.sigmoid(logits)
    mulv_ref[...] = mulv


def _run_fused_vae(x_stacked, eps_stacked, vae_idx, params):
    """x_stacked: (P, B, Din) f32; eps_stacked: (P, B, Z) f32; vae_idx: (P,) i32.
    Returns (recon (P,B,Din), mulv (P,B,2Z))."""
    P, B, Din = x_stacked.shape
    Z = eps_stacked.shape[-1]
    Hd = params["w_enc"].shape[-1]

    # Block indexed by the grid/path index p.
    def path_spec(tail):
        return pl.BlockSpec((None,) + tail, lambda p, idx: (p, 0, 0))

    # Block indexed by the per-path VAE id (scalar-prefetched).
    def vae_spec(tail):
        return pl.BlockSpec((None,) + tail, lambda p, idx: (idx[p], 0, 0))

    grid_spec = pltpu.PrefetchScalarGridSpec(
        num_scalar_prefetch=1,
        grid=(P,),
        in_specs=[
            path_spec((B, Din)),        # x
            path_spec((B, Z)),          # eps
            vae_spec((Din, Hd)),        # w_enc
            vae_spec((1, Hd)),          # b_enc
            vae_spec((Hd, 2 * Z)),      # w_mulv
            vae_spec((1, 2 * Z)),       # b_mulv
            vae_spec((Z, Hd)),          # w_d1
            vae_spec((1, Hd)),          # b_d1
            vae_spec((Hd, Din)),        # w_d2
            vae_spec((1, Din)),         # b_d2
        ],
        out_specs=[
            path_spec((B, Din)),        # recon
            path_spec((B, 2 * Z)),      # mu | logvar packed
        ],
    )

    out_shapes = (
        jax.ShapeDtypeStruct((P, B, Din), jnp.float32),
        jax.ShapeDtypeStruct((P, B, 2 * Z), jnp.float32),
    )

    recon, mulv = pl.pallas_call(
        _stereo_vae_kernel,
        grid_spec=grid_spec,
        out_shape=out_shapes,
        compiler_params=pltpu.CompilerParams(
            dimension_semantics=("parallel",),   # independent paths -> both TCs on v7x
        ),
    )(vae_idx, x_stacked, eps_stacked,
      params["w_enc"], params["b_enc"],
      params["w_mulv"], params["b_mulv"],
      params["w_d1"], params["b_d1"],
      params["w_d2"], params["b_d2"])
    return recon, mulv


# ---------------------------------------------------------------------------
# Parameter initialization (deterministic, in-script). Weights bf16, biases f32.
# ---------------------------------------------------------------------------
def init_state_vae_params(key, in_dim, hidden_dim, latent_dim):
    ks = jax.random.split(key, 5)

    def lin(kw, fan_in, fan_out):
        scale = 1.0 / jnp.sqrt(jnp.float32(fan_in))
        w = jax.random.normal(kw, (fan_in, fan_out), dtype=jnp.float32) * scale
        return w.astype(jnp.bfloat16)

    w_mu = lin(ks[1], hidden_dim, latent_dim)
    w_lv = lin(ks[2], hidden_dim, latent_dim)
    return {
        "w_enc": lin(ks[0], in_dim, hidden_dim),
        "b_enc": jnp.zeros((1, hidden_dim), jnp.float32),
        "w_mulv": jnp.concatenate([w_mu, w_lv], axis=1),       # (Hd, 2Z)
        "b_mulv": jnp.zeros((1, 2 * latent_dim), jnp.float32),
        "w_d1": lin(ks[3], latent_dim, hidden_dim),
        "b_d1": jnp.zeros((1, hidden_dim), jnp.float32),
        "w_d2": lin(ks[4], hidden_dim, in_dim),
        "b_d2": jnp.zeros((1, in_dim), jnp.float32),
    }


# ---------------------------------------------------------------------------
# jit-compiled forward paths (one pallas_call per forward)
# ---------------------------------------------------------------------------
def _split_path(recon, mulv, p, img_shape, z_dim):
    return (recon[p].reshape((recon.shape[1],) + img_shape),
            mulv[p, :, :z_dim],
            mulv[p, :, z_dim:])


def _forward_stereo(params, L_img, R_img, key):
    B = L_img.shape[0]
    img_shape = L_img.shape[1:]
    din = img_shape[0] * img_shape[1] * img_shape[2]
    z_dim = params["w_d1"].shape[1]

    Lf = L_img.reshape(B, din).astype(jnp.float32)
    Rf = R_img.reshape(B, din).astype(jnp.float32)

    # Path order: monoc(L), monoc(R), LR(R), RL(L).
    # The two monoc steps are adjacent so the weight block stays resident (no re-DMA).
    x = jnp.stack([Lf, Rf, Rf, Lf], axis=0)
    vae_idx = jnp.array([0, 0, 1, 2], dtype=jnp.int32)
    eps = jax.random.normal(key, (4, B, z_dim), dtype=jnp.float32)

    recon, mulv = _run_fused_vae(x, eps, vae_idx, params)

    LL = _split_path(recon, mulv, 0, img_shape, z_dim)
    RR = _split_path(recon, mulv, 1, img_shape, z_dim)
    LR = _split_path(recon, mulv, 2, img_shape, z_dim)
    RL = _split_path(recon, mulv, 3, img_shape, z_dim)
    return (LL, LR, RR, RL)


def _forward_mono(params, L_img, key):
    B = L_img.shape[0]
    img_shape = L_img.shape[1:]
    din = img_shape[0] * img_shape[1] * img_shape[2]
    z_dim = params["w_d1"].shape[1]

    Lf = L_img.reshape(B, din).astype(jnp.float32)

    # Path order: monoc(L), LR(L), RL(L).
    x = jnp.stack([Lf, Lf, Lf], axis=0)
    vae_idx = jnp.array([0, 1, 2], dtype=jnp.int32)
    eps = jax.random.normal(key, (3, B, z_dim), dtype=jnp.float32)

    recon, mulv = _run_fused_vae(x, eps, vae_idx, params)

    LL = _split_path(recon, mulv, 0, img_shape, z_dim)
    L = _split_path(recon, mulv, 1, img_shape, z_dim)
    R = _split_path(recon, mulv, 2, img_shape, z_dim)
    return (LL, L, R)


_forward_stereo_jit = jax.jit(_forward_stereo)
_forward_mono_jit = jax.jit(_forward_mono)


# ---------------------------------------------------------------------------
# StereoX wrapper: three StateVAE sub-modules (monoc, LR, RL) with stacked params.
# ---------------------------------------------------------------------------
class StereoXPallas:
    def __init__(self, latent_dim, img_shape, hidden_dim=32, seed=42):
        self.latent_dim = latent_dim
        self.img_shape = img_shape  # (C, H, W)
        C, H, W = img_shape
        in_dim = C * H * W
        k = jax.random.PRNGKey(seed)
        k_mono, k_lr, k_rl = jax.random.split(k, 3)
        per_vae = [
            init_state_vae_params(k_mono, in_dim, hidden_dim, latent_dim),  # 0: monoc
            init_state_vae_params(k_lr, in_dim, hidden_dim, latent_dim),    # 1: LR
            init_state_vae_params(k_rl, in_dim, hidden_dim, latent_dim),    # 2: RL
        ]
        # Stack each parameter along a leading VAE-index axis.
        self.params = {name: jnp.stack([p[name] for p in per_vae], axis=0)
                       for name in per_vae[0]}

    def __call__(self, L_img, R_img=None, eps_key=None):
        if eps_key is None:
            eps_key = jax.random.PRNGKey(7)
        if R_img is not None:
            return _forward_stereo_jit(self.params, L_img, R_img, eps_key)
        return _forward_mono_jit(self.params, L_img, eps_key)


if __name__ == "__main__":
    # Small deterministic example: batch=2, channels=4, spatial=16x16, latent_dim=8
    key = jax.random.PRNGKey(0)
    kL, kR, kE = jax.random.split(key, 3)
    B, C, H, W = 2, 4, 16, 16
    L_img = jax.random.uniform(kL, (B, C, H, W), dtype=jnp.float32)
    R_img = jax.random.uniform(kR, (B, C, H, W), dtype=jnp.float32)

    model = StereoXPallas(latent_dim=8, img_shape=(C, H, W), hidden_dim=32)

    # Stereo path (both images) -> (LL, LR, RR, RL)
    LL, LR, RR, RL = model(L_img, R_img, eps_key=kE)
    # Mono path (left image only) -> (LL, L, R)
    LL2, Lo, Ro = model(L_img, eps_key=kE)

    jax.block_until_ready((LL, LR, RR, RL, LL2, Lo, Ro))

    # Basic sanity checks on shapes / values
    assert LL[0].shape == (B, C, H, W)
    assert LL[1].shape == (B, 8) and LL[2].shape == (B, 8)
    assert LR[0].shape == (B, C, H, W)
    assert RR[0].shape == (B, C, H, W)
    assert RL[0].shape == (B, C, H, W)
    assert Lo[0].shape == (B, C, H, W) and Ro[0].shape == (B, C, H, W)
    assert bool(jnp.all(jnp.isfinite(LL[0])))
    assert bool(jnp.all((LL[0] >= 0.0) & (LL[0] <= 1.0)))  # sigmoid range

    print("KERNEL_OK")
</pallas_src>

<mosaic_0001>
module attributes {stable_mosaic.version = 11 : i64} {
  func.func @_stereo_vae_kernel(%arg0: i32, %arg1: memref<4xi32, #tpu.memory_space<smem>>, %arg2: memref<1x2x1024xf32, #tpu.memory_space<vmem>>, %arg3: memref<1x2x8xf32, #tpu.memory_space<vmem>>, %arg4: memref<1x1024x32xbf16, #tpu.memory_space<vmem>>, %arg5: memref<1x1x32xf32, #tpu.memory_space<vmem>>, %arg6: memref<1x32x16xbf16, #tpu.memory_space<vmem>>, %arg7: memref<1x1x16xf32, #tpu.memory_space<vmem>>, %arg8: memref<1x8x32xbf16, #tpu.memory_space<vmem>>, %arg9: memref<1x1x32xf32, #tpu.memory_space<vmem>>, %arg10: memref<1x32x1024xbf16, #tpu.memory_space<vmem>>, %arg11: memref<1x1x1024xf32, #tpu.memory_space<vmem>>, %arg12: memref<1x2x1024xf32, #tpu.memory_space<vmem>>, %arg13: memref<1x2x16xf32, #tpu.memory_space<vmem>>) attributes {dimension_semantics = [#tpu.dimension_semantics<parallel>], iteration_bounds = array<i64: 4>, scalar_prefetch = 1 : i64, scratch_operands = 0 : i64, tpu.core_type = #tpu.core_type<tc>, window_params = [{transform_indices = @transform_0, window_bounds = array<i64: 1, 2, 1024>}, {transform_indices = @transform_1, window_bounds = array<i64: 1, 2, 8>}, {transform_indices = @transform_2, window_bounds = array<i64: 1, 1024, 32>}, {transform_indices = @transform_3, window_bounds = array<i64: 1, 1, 32>}, {transform_indices = @transform_4, window_bounds = array<i64: 1, 32, 16>}, {transform_indices = @transform_5, window_bounds = array<i64: 1, 1, 16>}, {transform_indices = @transform_6, window_bounds = array<i64: 1, 8, 32>}, {transform_indices = @transform_7, window_bounds = array<i64: 1, 1, 32>}, {transform_indices = @transform_8, window_bounds = array<i64: 1, 32, 1024>}, {transform_indices = @transform_9, window_bounds = array<i64: 1, 1, 1024>}, {transform_indices = @transform_10, window_bounds = array<i64: 1, 2, 1024>}, {transform_indices = @transform_11, window_bounds = array<i64: 1, 2, 16>}]} {
    %c0 = arith.constant 0 : index
    %c0_0 = arith.constant 0 : index
    %c0_1 = arith.constant 0 : index
    %0 = vector.load %arg2[%c0, %c0_0, %c0_1] : memref<1x2x1024xf32, #tpu.memory_space<vmem>>, vector<1x2x1024xf32>
    %1 = vector.shape_cast %0 : vector<1x2x1024xf32> to vector<2x1024xf32>
    %2 = arith.truncf %1 : vector<2x1024xf32> to vector<2x1024xbf16>
    %c0_2 = arith.constant 0 : index
    %c0_3 = arith.constant 0 : index
    %c0_4 = arith.constant 0 : index
    %3 = vector.load %arg4[%c0_2, %c0_3, %c0_4] : memref<1x1024x32xbf16, #tpu.memory_space<vmem>>, vector<1x1024x32xbf16>
    %4 = vector.shape_cast %3 : vector<1x1024x32xbf16> to vector<1024x32xbf16>
    %cst = arith.constant dense<0.000000e+00> : vector<2x32xf32>
    %5 = tpu.matmul %2, %4, %cst {dimension_numbers = #tpu.dot_dimension_numbers<[1], [0], [0], [1], [0, 0, 1, 1], [], []>} : vector<2x1024xbf16>, vector<1024x32xbf16>, vector<2x32xf32> -> vector<2x32xf32>
    %c0_5 = arith.constant 0 : index
    %c0_6 = arith.constant 0 : index
    %c0_7 = arith.constant 0 : index
    %6 = vector.load %arg5[%c0_5, %c0_6, %c0_7] : memref<1x1x32xf32, #tpu.memory_space<vmem>>, vector<1x1x32xf32>
    %7 = vector.shape_cast %6 : vector<1x1x32xf32> to vector<1x32xf32>
    %8 = vector.broadcast %7 : vector<1x32xf32> to vector<2x32xf32>
    %9 = arith.addf %5, %8 : vector<2x32xf32>
    %cst_8 = arith.constant 0.000000e+00 : f32
    %10 = vector.broadcast %cst_8 : f32 to vector<2x32xf32>
    %11 = arith.maximumf %9, %10 : vector<2x32xf32>
    %12 = arith.truncf %11 : vector<2x32xf32> to vector<2x32xbf16>
    %c0_9 = arith.constant 0 : index
    %c0_10 = arith.constant 0 : index
    %c0_11 = arith.constant 0 : index
    %13 = vector.load %arg6[%c0_9, %c0_10, %c0_11] : memref<1x32x16xbf16, #tpu.memory_space<vmem>>, vector<1x32x16xbf16>
    %14 = vector.shape_cast %13 : vector<1x32x16xbf16> to vector<32x16xbf16>
    %cst_12 = arith.constant dense<0.000000e+00> : vector<2x16xf32>
    %15 = tpu.matmul %12, %14, %cst_12 {dimension_numbers = #tpu.dot_dimension_numbers<[1], [0], [0], [1], [0, 0, 1, 1], [], []>} : vector<2x32xbf16>, vector<32x16xbf16>, vector<2x16xf32> -> vector<2x16xf32>
    %c0_13 = arith.constant 0 : index
    %c0_14 = arith.constant 0 : index
    %c0_15 = arith.constant 0 : index
    %16 = vector.load %arg7[%c0_13, %c0_14, %c0_15] : memref<1x1x16xf32, #tpu.memory_space<vmem>>, vector<1x1x16xf32>
    %17 = vector.shape_cast %16 : vector<1x1x16xf32> to vector<1x16xf32>
    %18 = vector.broadcast %17 : vector<1x16xf32> to vector<2x16xf32>
    %19 = arith.addf %15, %18 : vector<2x16xf32>
    %20 = vector.extract_strided_slice %19 {offsets = [0, 0], sizes = [2, 8], strides = [1, 1]} : vector<2x16xf32> to vector<2x8xf32>
    %21 = vector.extract_strided_slice %19 {offsets = [0, 8], sizes = [2, 8], strides = [1, 1]} : vector<2x16xf32> to vector<2x8xf32>
    %cst_16 = arith.constant 5.000000e-01 : f32
    %22 = vector.broadcast %cst_16 : f32 to vector<2x8xf32>
    %23 = arith.mulf %22, %21 : vector<2x8xf32>
    %24 = math.exp %23 : vector<2x8xf32>
    %c0_17 = arith.constant 0 : index
    %c0_18 = arith.constant 0 : index
    %c0_19 = arith.constant 0 : index
    %25 = vector.load %arg3[%c0_17, %c0_18, %c0_19] : memref<1x2x8xf32, #tpu.memory_space<vmem>>, vector<1x2x8xf32>
    %26 = vector.shape_cast %25 : vector<1x2x8xf32> to vector<2x8xf32>
    %27 = arith.mulf %24, %26 : vector<2x8xf32>
    %28 = arith.addf %20, %27 : vector<2x8xf32>
    %29 = arith.truncf %28 : vector<2x8xf32> to vector<2x8xbf16>
    %c0_20 = arith.constant 0 : index
    %c0_21 = arith.constant 0 : index
    %c0_22 = arith.constant 0 : index
    %30 = vector.load %arg8[%c0_20, %c0_21, %c0_22] : memref<1x8x32xbf16, #tpu.memory_space<vmem>>, vector<1x8x32xbf16>
    %31 = vector.shape_cast %30 : vector<1x8x32xbf16> to vector<8x32xbf16>
    %cst_23 = arith.constant dense<0.000000e+00> : vector<2x32xf32>
    %32 = tpu.matmul %29, %31, %cst_23 {dimension_numbers = #tpu.dot_dimension_numbers<[1], [0], [0], [1], [0, 0, 1, 1], [], []>} : vector<2x8xbf16>, vector<8x32xbf16>, vector<2x32xf32> -> vector<2x32xf32>
    %c0_24 = arith.constant 0 : index
    %c0_25 = arith.constant 0 : index
    %c0_26 = arith.constant 0 : index
    %33 = vector.load %arg9[%c0_24, %c0_25, %c0_26] : memref<1x1x32xf32, #tpu.memory_space<vmem>>, vector<1x1x32xf32>
    %34 = vector.shape_cast %33 : vector<1x1x32xf32> to vector<1x32xf32>
    %35 = vector.broadcast %34 : vector<1x32xf32> to vector<2x32xf32>
    %36 = arith.addf %32, %35 : vector<2x32xf32>
    %cst_27 = arith.constant 0.000000e+00 : f32
    %37 = vector.broadcast %cst_27 : f32 to vector<2x32xf32>
    %38 = arith.maximumf %36, %37 : vector<2x32xf32>
    %39 = arith.truncf %38 : vector<2x32xf32> to vector<2x32xbf16>
    %c0_28 = arith.constant 0 : index
    %c0_29 = arith.constant 0 : index
    %c0_30 = arith.constant 0 : index
    %40 = vector.load %arg10[%c0_28, %c0_29, %c0_30] : memref<1x32x1024xbf16, #tpu.memory_space<vmem>>, vector<1x32x1024xbf16>
    %41 = vector.shape_cast %40 : vector<1x32x1024xbf16> to vector<32x1024xbf16>
    %cst_31 = arith.constant dense<0.000000e+00> : vector<2x1024xf32>
    %42 = tpu.matmul %39, %41, %cst_31 {dimension_numbers = #tpu.dot_dimension_numbers<[1], [0], [0], [1], [0, 0, 1, 1], [], []>} : vector<2x32xbf16>, vector<32x1024xbf16>, vector<2x1024xf32> -> vector<2x1024xf32>
    %c0_32 = arith.constant 0 : index
    %c0_33 = arith.constant 0 : index
    %c0_34 = arith.constant 0 : index
    %43 = vector.load %arg11[%c0_32, %c0_33, %c0_34] : memref<1x1x1024xf32, #tpu.memory_space<vmem>>, vector<1x1x1024xf32>
    %44 = vector.shape_cast %43 : vector<1x1x1024xf32> to vector<1x1024xf32>
    %45 = vector.broadcast %44 : vector<1x1024xf32> to vector<2x1024xf32>
    %46 = arith.addf %42, %45 : vector<2x1024xf32>
    %47 = arith.negf %46 : vector<2x1024xf32>
    %48 = math.exp %47 : vector<2x1024xf32>
    %cst_35 = arith.constant 1.000000e+00 : f32
    %49 = vector.broadcast %cst_35 : f32 to vector<2x1024xf32>
    %50 = arith.addf %49, %48 : vector<2x1024xf32>
    %51 = arith.divf %49, %50 : vector<2x1024xf32>
    %c0_36 = arith.constant 0 : index
    %c0_37 = arith.constant 0 : index
    %c0_38 = arith.constant 0 : index
    %52 = vector.load %arg12[%c0_36, %c0_37, %c0_38] : memref<1x2x1024xf32, #tpu.memory_space<vmem>>, vector<1x2x1024xf32>
    %53 = vector.shape_cast %52 : vector<1x2x1024xf32> to vector<2x1024xf32>
    %54 = vector.shape_cast %51 : vector<2x1024xf32> to vector<1x2x1024xf32>
    tpu.vector_store %arg12[%c0_36, %c0_37, %c0_38], %54 {strides = array<i32>} : memref<1x2x1024xf32, #tpu.memory_space<vmem>>, vector<1x2x1024xf32>,
    %c0_39 = arith.constant 0 : index
    %c0_40 = arith.constant 0 : index
    %c0_41 = arith.constant 0 : index
    %55 = vector.load %arg13[%c0_39, %c0_40, %c0_41] : memref<1x2x16xf32, #tpu.memory_space<vmem>>, vector<1x2x16xf32>
    %56 = vector.shape_cast %55 : vector<1x2x16xf32> to vector<2x16xf32>
    %57 = vector.shape_cast %19 : vector<2x16xf32> to vector<1x2x16xf32>
    tpu.vector_store %arg13[%c0_39, %c0_40, %c0_41], %57 {strides = array<i32>} : memref<1x2x16xf32, #tpu.memory_space<vmem>>, vector<1x2x16xf32>,
    return
  }
  func.func @transform_0(%arg0: i32, %arg1: memref<4xi32, #tpu.memory_space<smem>>) -> (i32, i32, i32) {
    %c0_i32 = arith.constant 0 : i32
    %c0_i32_0 = arith.constant 0 : i32
    %c0_i32_1 = arith.constant 0 : i32
    return %arg0, %c0_i32, %c0_i32_0 : i32, i32, i32
  }
  func.func @transform_1(%arg0: i32, %arg1: memref<4xi32, #tpu.memory_space<smem>>) -> (i32, i32, i32) {
    %c0_i32 = arith.constant 0 : i32
    %c0_i32_0 = arith.constant 0 : i32
    %c0_i32_1 = arith.constant 0 : i32
    return %arg0, %c0_i32, %c0_i32_0 : i32, i32, i32
  }
  func.func @transform_2(%arg0: i32, %arg1: memref<4xi32, #tpu.memory_space<smem>>) -> (i32, i32, i32) {
    %0 = arith.index_cast %arg0 : i32 to index
    %1 = memref.load %arg1[%0] : memref<4xi32, #tpu.memory_space<smem>>
    %c0_i32 = arith.constant 0 : i32
    %c0_i32_0 = arith.constant 0 : i32
    %c0_i32_1 = arith.constant 0 : i32
    return %1, %c0_i32, %c0_i32_0 : i32, i32, i32
  }
  func.func @transform_3(%arg0: i32, %arg1: memref<4xi32, #tpu.memory_space<smem>>) -> (i32, i32, i32) {
    %0 = arith.index_cast %arg0 : i32 to index
    %1 = memref.load %arg1[%0] : memref<4xi32, #tpu.memory_space<smem>>
    %c0_i32 = arith.constant 0 : i32
    %c0_i32_0 = arith.constant 0 : i32
    %c0_i32_1 = arith.constant 0 : i32
    return %1, %c0_i32, %c0_i32_0 : i32, i32, i32
  }
  func.func @transform_4(%arg0: i32, %arg1: memref<4xi32, #tpu.memory_space<smem>>) -> (i32, i32, i32) {
    %0 = arith.index_cast %arg0 : i32 to index
    %1 = memref.load %arg1[%0] : memref<4xi32, #tpu.memory_space<smem>>
    %c0_i32 = arith.constant 0 : i32
    %c0_i32_0 = arith.constant 0 : i32
    %c0_i32_1 = arith.constant 0 : i32
    return %1, %c0_i32, %c0_i32_0 : i32, i32, i32
  }
  func.func @transform_5(%arg0: i32, %arg1: memref<4xi32, #tpu.memory_space<smem>>) -> (i32, i32, i32) {
    %0 = arith.index_cast %arg0 : i32 to index
    %1 = memref.load %arg1[%0] : memref<4xi32, #tpu.memory_space<smem>>
    %c0_i32 = arith.constant 0 : i32
    %c0_i32_0 = arith.constant 0 : i32
    %c0_i32_1 = arith.constant 0 : i32
    return %1, %c0_i32, %c0_i32_0 : i32, i32, i32
  }
  func.func @transform_6(%arg0: i32, %arg1: memref<4xi32, #tpu.memory_space<smem>>) -> (i32, i32, i32) {
    %0 = arith.index_cast %arg0 : i32 to index
    %1 = memref.load %arg1[%0] : memref<4xi32, #tpu.memory_space<smem>>
    %c0_i32 = arith.constant 0 : i32
    %c0_i32_0 = arith.constant 0 : i32
    %c0_i32_1 = arith.constant 0 : i32
    return %1, %c0_i32, %c0_i32_0 : i32, i32, i32
  }
  func.func @transform_7(%arg0: i32, %arg1: memref<4xi32, #tpu.memory_space<smem>>) -> (i32, i32, i32) {
    %0 = arith.index_cast %arg0 : i32 to index
    %1 = memref.load %arg1[%0] : memref<4xi32, #tpu.memory_space<smem>>
    %c0_i32 = arith.constant 0 : i32
    %c0_i32_0 = arith.constant 0 : i32
    %c0_i32_1 = arith.constant 0 : i32
    return %1, %c0_i32, %c0_i32_0 : i32, i32, i32
  }
  func.func @transform_8(%arg0: i32, %arg1: memref<4xi32, #tpu.memory_space<smem>>) -> (i32, i32, i32) {
    %0 = arith.index_cast %arg0 : i32 to index
    %1 = memref.load %arg1[%0] : memref<4xi32, #tpu.memory_space<smem>>
    %c0_i32 = arith.constant 0 : i32
    %c0_i32_0 = arith.constant 0 : i32
    %c0_i32_1 = arith.constant 0 : i32
    return %1, %c0_i32, %c0_i32_0 : i32, i32, i32
  }
  func.func @transform_9(%arg0: i32, %arg1: memref<4xi32, #tpu.memory_space<smem>>) -> (i32, i32, i32) {
    %0 = arith.index_cast %arg0 : i32 to index
    %1 = memref.load %arg1[%0] : memref<4xi32, #tpu.memory_space<smem>>
    %c0_i32 = arith.constant 0 : i32
    %c0_i32_0 = arith.constant 0 : i32
    %c0_i32_1 = arith.constant 0 : i32
    return %1, %c0_i32, %c0_i32_0 : i32, i32, i32
  }
  func.func @transform_10(%arg0: i32, %arg1: memref<4xi32, #tpu.memory_space<smem>>) -> (i32, i32, i32) {
    %c0_i32 = arith.constant 0 : i32
    %c0_i32_0 = arith.constant 0 : i32
    %c0_i32_1 = arith.constant 0 : i32
    return %arg0, %c0_i32, %c0_i32_0 : i32, i32, i32
  }
  func.func @transform_11(%arg0: i32, %arg1: memref<4xi32, #tpu.memory_space<smem>>) -> (i32, i32, i32) {
    %c0_i32 = arith.constant 0 : i32
    %c0_i32_0 = arith.constant 0 : i32
    %c0_i32_1 = arith.constant 0 : i32
    return %arg0, %c0_i32, %c0_i32_0 : i32, i32, i32
  }
}

</mosaic_0001>

<bundles_post_ra>
// kernel: squeeze.25
= control target key start
LH: loop header
LB: loop body
LE: loop exit
PB: predicated region body
PF: predicated region fallthrough
CT: control target
= control target key end

     0   :  { %s420_s0 = inlined_call_operand.vmem [shape: f32[1,2,1024], index: 0, kind: input, shape index: {}]   ;;  %s421_s1 = inlined_call_operand.hbm [shape: f32[2,4,16,16], index: 1, kind: output, shape index: {}]  }
   0x1   :  { %v280_v0 = vld [vmem:[%s420_s0 + $0x6] sm:$0x3]  ;;  %v281_v1 = vld [vmem:[%s420_s0 + $0x4] sm:$0x3]  ;;  %v282_v2 = vld [vmem:[%s420_s0 + $0x2] sm:$0x3] }
   0x2   :  { %24 = vst [vmem:[#allocation2 + $0x18] sm:$0x3] %v280_v0  ;;  %v33_v3 = vld [vmem:[%s420_s0] sm:$0x3]  ;;  %v276_v4 = vld [vmem:[%s420_s0 + $0xe] sm:$0x3] }
   0x3   :  { %28 = vst [vmem:[#allocation2 + $0x10] sm:$0x3] %v281_v1  ;;  %v277_v5 = vld [vmem:[%s420_s0 + $0xc] sm:$0x3]  ;;  %v278_v6 = vld [vmem:[%s420_s0 + $0xa] sm:$0x3] }
   0x4   :  { %32 = vst [vmem:[#allocation2 + $0x8] sm:$0x3] %v282_v2  ;;  %v279_v7 = vld [vmem:[%s420_s0 + $0x8] sm:$0x3] }
   0x5   :  { %34 = vst [vmem:[#allocation2] sm:$0x3] %v33_v3 }
   0x6   :  { %8 = vst [vmem:[#allocation2 + $0x38] sm:$0x3] %v276_v4 }
   0x7   :  { %2 = vsyncpa [#allocation1], 0  ;;  %12 = vst [vmem:[#allocation2 + $0x30] sm:$0x3] %v277_v5  ;;  %vm92_vm0 = vcmask 1047556   ;;  %s317_s0 = smov 96  }
   0x8   :  { %16 = vst [vmem:[#allocation2 + $0x28] sm:$0x3] %v278_v6  ;;  %s318_s22 = smov 112   ;;  %s319_s23 = smov 80   ;;  %vm36_vm1 = vcmask 130048  }
   0x9   :  { %20 = vst [vmem:[#allocation2 + $0x20] sm:$0x3] %v279_v7  ;;  %s320_s24 = smov 64   ;;  %s321_s25 = smov 32   ;;  %v55_v63 = vld [vmem:[#allocation2 + $0x18] sm:$0x3]  }
   0xa   :  { %s322_s26 = smov 48   ;;  %s323_s27 = smov 16   ;;  %v48_v62 = vld [vmem:[#allocation2 + $0x10] sm:$0x3]   ;;  %58 = vst.msk [vmem:[#allocation0 + $0x18] sm:$0x1] %vm36_vm1, %v55_v63  }
   0xb   :  { %v41_v59 = vld [vmem:[#allocation2 + $0x8] sm:$0x3]   ;;  %51 = vst.msk [vmem:[#allocation0 + $0x10] sm:$0x1] %vm36_vm1, %v48_v62   ;;  %s324_s28 = smov [#allocation0]   ;;  %s269_s1 = sshll.u32 %s421_s1, 4  ;;  %s270_s1 = int_to_ptr.hbm [resolvable:$true] %s269_s1 }
   0xc   :  { %v114_v8 = vld [vmem:[#allocation2] ss:$8 sm:$0xf]   ;;  %v116_v9 = vld [vmem:[#allocation2 - $0x1f] ss:$8 sm:$0xf0]  }
   0xd   :  { %v118_v10 = vsel %vm92_vm0, %v116_v9, %v114_v8  ;;  %v89_v11 = vld [vmem:[#allocation2] ss:$8 sm:$0xf]   ;;  %v91_v12 = vld [vmem:[#allocation2 - $0x1f] ss:$8 sm:$0xf0]  }
   0xe   :  { %119 = vrot.lane.b32.xlu1 %v118_v10, %s317_s0  ;;  %v93_v13 = vsel %vm92_vm0, %v91_v12, %v89_v11  ;;  %v139_v20 = vld [vmem:[#allocation2] ss:$8 sm:$0xf]   ;;  %v141_v21 = vld [vmem:[#allocation2 - $0x1f] ss:$8 sm:$0xf0]  }
   0xf   :  { %94 = vrot.lane.b32.xlu0 %v93_v13, %s318_s22  ;;  %v143_v22 = vsel %vm92_vm0, %v141_v21, %v139_v20  ;;  %v164_v27 = vld [vmem:[#allocation2] ss:$8 sm:$0xf]   ;;  %v166_v28 = vld [vmem:[#allocation2 - $0x1f] ss:$8 sm:$0xf0]  }
  0x10   :  { %v127_v14 = vld [vmem:[#allocation2 + $0x20] ss:$8 sm:$0xf]   ;;  %v129_v15 = vld [vmem:[#allocation2 + $0x1] ss:$8 sm:$0xf0]   ;;  %144 = vrot.lane.b32.xlu2 %v143_v22, %s319_s23  ;;  %v168_v31 = vsel %vm92_vm0, %v166_v28, %v164_v27 }
  0x11   :  { %v102_v16 = vld [vmem:[#allocation2 + $0x20] ss:$8 sm:$0xf]   ;;  %v104_v17 = vld [vmem:[#allocation2 + $0x1] ss:$8 sm:$0xf0]   ;;  %v131_v18 = vsel %vm92_vm0, %v129_v15, %v127_v14 }
  0x12   :  { %v106_v19 = vsel %vm92_vm0, %v104_v17, %v102_v16  ;;  %v177_v23 = vld [vmem:[#allocation2 + $0x20] ss:$8 sm:$0xf]   ;;  %v179_v24 = vld [vmem:[#allocation2 + $0x1] ss:$8 sm:$0xf0]  }
  0x13   :  { %v152_v25 = vld [vmem:[#allocation2 + $0x20] ss:$8 sm:$0xf]   ;;  %v154_v26 = vld [vmem:[#allocation2 + $0x1] ss:$8 sm:$0xf0]   ;;  %v181_v29 = vsel %vm92_vm0, %v179_v24, %v177_v23 }
  0x14   :  { %v156_v30 = vsel %vm92_vm0, %v154_v26, %v152_v25  ;;  %v214_v32 = vld [vmem:[#allocation2] ss:$8 sm:$0xf]   ;;  %v216_v33 = vld [vmem:[#allocation2 - $0x1f] ss:$8 sm:$0xf0]  }
  0x15   :  { %v189_v34 = vld [vmem:[#allocation2] ss:$8 sm:$0xf]   ;;  %v191_v35 = vld [vmem:[#allocation2 - $0x1f] ss:$8 sm:$0xf0]   ;;  %v218_v38 = vsel %vm92_vm0, %v216_v33, %v214_v32 }
  0x16   :  { %132 = vrot.lane.b32.xlu1 %v131_v18, %s317_s0  ;;  %v202_v36 = vld [vmem:[#allocation2 + $0x20] ss:$8 sm:$0xf]   ;;  %v204_v37 = vld [vmem:[#allocation2 + $0x1] ss:$8 sm:$0xf0]   ;;  %v193_v39 = vsel %vm92_vm0, %v191_v35, %v189_v34 }
  0x17   :  { %107 = vrot.lane.b32.xlu0 %v106_v19, %s318_s22  ;;  %v206_v40 = vsel %vm92_vm0, %v204_v37, %v202_v36  ;;  %v252_v41 = vld [vmem:[#allocation2 + $0x20] ss:$8 sm:$0xf]   ;;  %v254_v42 = vld [vmem:[#allocation2 + $0x1] ss:$8 sm:$0xf0]  }
  0x18   :  { %157 = vrot.lane.b32.xlu2 %v156_v30, %s319_s23  ;;  %v227_v43 = vld [vmem:[#allocation2 + $0x20] ss:$8 sm:$0xf]   ;;  %v229_v44 = vld [vmem:[#allocation2 + $0x1] ss:$8 sm:$0xf0]   ;;  %v256_v47 = vsel %vm92_vm0, %v254_v42, %v252_v41 }
  0x19   :  { %v239_v45 = vld [vmem:[#allocation2] ss:$8 sm:$0xf]   ;;  %v241_v46 = vld [vmem:[#allocation2 - $0x1f] ss:$8 sm:$0xf0]   ;;  %v231_v48 = vsel %vm92_vm0, %v229_v44, %v227_v43 }
  0x1a   :  { %v243_v49 = vsel %vm92_vm0, %v241_v46, %v239_v45  ;;  %v35_v55 = vld [vmem:[#allocation2] sm:$0x3]   ;;  %44 = vst.msk [vmem:[#allocation0 + $0x8] sm:$0x1] %vm36_vm1, %v41_v59   ;;  %v69_v3 = vld [vmem:[#allocation2 + $0x28] sm:$0x3]  }
  0x1b   :  { %37 = vst.msk [vmem:[#allocation0] sm:$0x1] %vm36_vm1, %v35_v55   ;;  %v62_v2 = vld [vmem:[#allocation2 + $0x20] sm:$0x3]   ;;  %v76_v6 = vld [vmem:[#allocation2 + $0x30] sm:$0x3]  }
  0x1c   :  { %39 = vst.msk [vmem:[#allocation0 + $0x3f] sm:$0x2] %vm36_vm1, %v35_v55   ;;  %s267_s29 = sshll.u32 %s324_s28, 4  ;;  %v83_v7 = vld [vmem:[#allocation2 + $0x38] sm:$0x3]   ;;  %s268_s29 = int_to_ptr.vmem [resolvable:$true] %s267_s29 }
  0x1d   :  { %46 = vst.msk [vmem:[#allocation0 + $0x47] sm:$0x2] %vm36_vm1, %v41_v59  }
  0x1e   :  { %182 = vrot.lane.b32.xlu1 %v181_v29, %s320_s24  ;;  %53 = vst.msk [vmem:[#allocation0 + $0x4f] sm:$0x2] %vm36_vm1, %v48_v62  }
  0x1f   :  { %169 = vrot.lane.b32.xlu0 %v168_v31, %s320_s24  ;;  %60 = vst.msk [vmem:[#allocation0 + $0x57] sm:$0x2] %vm36_vm1, %v55_v63  }
  0x20   :  { %194 = vrot.lane.b32.xlu2 %v193_v39, %s322_s26  ;;  %65 = vst.msk [vmem:[#allocation0 + $0x20] sm:$0x1] %vm36_vm1, %v62_v2  }
  0x21   :  { %67 = vst.msk [vmem:[#allocation0 + $0x5f] sm:$0x2] %vm36_vm1, %v62_v2  }
  0x22   :  { %72 = vst.msk [vmem:[#allocation0 + $0x28] sm:$0x1] %vm36_vm1, %v69_v3  }
  0x23   :  { %74 = vst.msk [vmem:[#allocation0 + $0x67] sm:$0x2] %vm36_vm1, %v69_v3  }
  0x24   :  { %79 = vst.msk [vmem:[#allocation0 + $0x30] sm:$0x1] %vm36_vm1, %v76_v6  }
  0x25   :  { %81 = vst.msk [vmem:[#allocation0 + $0x6f] sm:$0x2] %vm36_vm1, %v76_v6  }
  0x26   :  { %219 = vrot.lane.b32.xlu1 %v218_v38, %s321_s25  ;;  %86 = vst.msk [vmem:[#allocation0 + $0x38] sm:$0x1] %vm36_vm1, %v83_v7  }
  0x27   :  { %207 = vrot.lane.b32.xlu0 %v206_v40, %s322_s26  ;;  %88 = vst.msk [vmem:[#allocation0 + $0x77] sm:$0x2] %vm36_vm1, %v83_v7  }
  0x28   :  { %232 = vrot.lane.b32.xlu2 %v231_v48, %s321_s25 }
  0x2e   :  { %257 = vrot.lane.b32.xlu1 %v256_v47, %s323_s27 }
  0x2f   :  { %244 = vrot.lane.b32.xlu0 %v243_v49, %s323_s27 }
  0x6a   :  { %v145_v50 = vpop.permute.xlu2 %144  }
  0x6b   :  { %148 = vst.msk [vmem:[#allocation0 + $0x3] ss:$8 sm:$0xf] %vm36_vm1, %v145_v50  }
  0x6c   :  { %150 = vst.msk [vmem:[#allocation0 + $0x23] ss:$8 sm:$0xf0] %vm36_vm1, %v145_v50  }
  0x72   :  { %v158_v51 = vpop.permute.xlu2 %157  }
  0x73   :  { %161 = vst.msk [vmem:[#allocation0 + $0x23] ss:$8 sm:$0xf] %vm36_vm1, %v158_v51  }
  0x74   :  { %163 = vst.msk [vmem:[#allocation0 + $0x43] ss:$8 sm:$0xf0] %vm36_vm1, %v158_v51  }
  0x7a   :  { %v195_v53 = vpop.permute.xlu2 %194  }
  0x7b   :  { %198 = vst.msk [vmem:[#allocation0 + $0x5] ss:$8 sm:$0xf] %vm36_vm1, %v195_v53  }
  0x7c   :  { %200 = vst.msk [vmem:[#allocation0 + $0x25] ss:$8 sm:$0xf0] %vm36_vm1, %v195_v53  }
  0x80   :  { %v120_v52 = vpop.permute.xlu1 %119  }
  0x81   :  { %123 = vst.msk [vmem:[#allocation0 + $0x2] ss:$8 sm:$0xf] %vm36_vm1, %v120_v52   ;;  %v95_v54 = vpop.permute.xlu0 %94  }
  0x82   :  { %125 = vst.msk [vmem:[#allocation0 + $0x22] ss:$8 sm:$0xf0] %vm36_vm1, %v120_v52   ;;  %v233_v57 = vpop.permute.xlu2 %232  }
  0x83   :  { %98 = vst.msk [vmem:[#allocation0 + $0x1] ss:$8 sm:$0xf] %vm36_vm1, %v95_v54  }
  0x84   :  { %100 = vst.msk [vmem:[#allocation0 + $0x21] ss:$8 sm:$0xf0] %vm36_vm1, %v95_v54  }
  0x85   :  { %236 = vst.msk [vmem:[#allocation0 + $0x26] ss:$8 sm:$0xf] %vm36_vm1, %v233_v57  }
  0x86   :  { %238 = vst.msk [vmem:[#allocation0 + $0x46] ss:$8 sm:$0xf0] %vm36_vm1, %v233_v57  }
  0x88   :  { %v133_v56 = vpop.permute.xlu1 %132  }
  0x89   :  { %136 = vst.msk [vmem:[#allocation0 + $0x22] ss:$8 sm:$0xf] %vm36_vm1, %v133_v56   ;;  %v108_v58 = vpop.permute.xlu0 %107  }
  0x8a   :  { %138 = vst.msk [vmem:[#allocation0 + $0x42] ss:$8 sm:$0xf0] %vm36_vm1, %v133_v56  }
  0x8b   :  { %111 = vst.msk [vmem:[#allocation0 + $0x21] ss:$8 sm:$0xf] %vm36_vm1, %v108_v58  }
  0x8c   :  { %113 = vst.msk [vmem:[#allocation0 + $0x41] ss:$8 sm:$0xf0] %vm36_vm1, %v108_v58  }
  0x90   :  { %v183_v60 = vpop.permute.xlu1 %182  }
  0x91   :  { %186 = vst.msk [vmem:[#allocation0 + $0x24] ss:$8 sm:$0xf] %vm36_vm1, %v183_v60   ;;  %v170_v61 = vpop.permute.xlu0 %169  }
  0x92   :  { %188 = vst.msk [vmem:[#allocation0 + $0x44] ss:$8 sm:$0xf0] %vm36_vm1, %v183_v60  }
  0x93   :  { %173 = vst.msk [vmem:[#allocation0 + $0x4] ss:$8 sm:$0xf] %vm36_vm1, %v170_v61  }
  0x94   :  { %175 = vst.msk [vmem:[#allocation0 + $0x24] ss:$8 sm:$0xf0] %vm36_vm1, %v170_v61  }
  0x98   :  { %v220_v0 = vpop.permute.xlu1 %219  }
  0x99   :  { %223 = vst.msk [vmem:[#allocation0 + $0x6] ss:$8 sm:$0xf] %vm36_vm1, %v220_v0   ;;  %v208_v1 = vpop.permute.xlu0 %207  }
  0x9a   :  { %225 = vst.msk [vmem:[#allocation0 + $0x26] ss:$8 sm:$0xf0] %vm36_vm1, %v220_v0  }
  0x9b   :  { %211 = vst.msk [vmem:[#allocation0 + $0x25] ss:$8 sm:$0xf] %vm36_vm1, %v208_v1  }
  0x9c   :  { %213 = vst.msk [vmem:[#allocation0 + $0x45] ss:$8 sm:$0xf0] %vm36_vm1, %v208_v1  }
  0xa0   :  { %v258_v4 = vpop.permute.xlu1 %257  }
  0xa1   :  { %261 = vst.msk [vmem:[#allocation0 + $0x27] ss:$8 sm:$0xf] %vm36_vm1, %v258_v4   ;;  %v245_v5 = vpop.permute.xlu0 %244  }
  0xa2   :  { %263 = vst.msk [vmem:[#allocation0 + $0x47] ss:$8 sm:$0xf0] %vm36_vm1, %v258_v4  }
  0xa3   :  { %248 = vst.msk [vmem:[#allocation0 + $0x7] ss:$8 sm:$0xf] %vm36_vm1, %v245_v5  }
  0xa4   :  { %250 = vst.msk [vmem:[#allocation0 + $0x27] ss:$8 sm:$0xf0] %vm36_vm1, %v245_v5  }
  0xa5   :  { %272 = dma.vmem_to_hbm [thread:$0]  %s268_s29, 2048, %s270_s1, [#allocation1]  }
  0xa6   :  { %315 = dma.done.wait [#allocation1], 2048  }
  0xa7   :  { %316 = vsyncadd [#allocation1], 4294965248 }
  0xa8   :  { %275 = vsyncpa [#allocation1], 1 }

// kernel: _forward_stereo.1
= control target key start
LH: loop header
LB: loop body
LE: loop exit
PB: predicated region body
PF: predicated region fallthrough
CT: control target
= control target key end

     0   :  { %s2460_s24 = smov [#allocation3]   ;;  %s2845_s0 = inlined_call_operand.vmem [shape: s32[4], index: 0, kind: input, shape index: {}]   ;;  %s2846_s1 = inlined_call_operand.vmem [shape: f32[4,2,1024], index: 1, kind: input, shape index: {}]   ;;  %s2847_s2 = inlined_call_operand.vmem [shape: f32[4,2,8], index: 2, kind: input, shape index: {}]   ;;  %s2848_s3 = inlined_call_operand.vmem [shape: bf16[3,1024,32], index: 3, kind: input, shape index: {}]   ;;  %s2849_s4 = inlined_call_operand.vmem [shape: f32[3,1,32], index: 4, kind: input, shape index: {}]   ;;  %s2850_s5 = inlined_call_operand.vmem [shape: bf16[3,32,16], index: 5, kind: input, shape index: {}]   ;;  %s2851_s6 = inlined_call_operand.vmem [shape: f32[3,1,16], index: 6, kind: input, shape index: {}]   ;;  %s2852_s7 = inlined_call_operand.vmem [shape: bf16[3,8,32], index: 7, kind: input, shape index: {}]   ;;  %s2853_s8 = inlined_call_operand.vmem [shape: f32[3,1,32], index: 8, kind: input, shape index: {}]   ;;  %s2854_s9 = inlined_call_operand.vmem [shape: bf16[3,32,1024], index: 9, kind: input, shape index: {}]   ;;  %s2855_s10 = inlined_call_operand.vmem [shape: f32[3,1,1024], index: 10, kind: input, shape index: {}]   ;;  %s2856_s11 = inlined_call_operand.vmem [shape: f32[4,2,1024], index: 11, kind: output, shape index: {0}]   ;;  %s2857_s12 = inlined_call_operand.vmem [shape: f32[4,2,16], index: 12, kind: output, shape index: {1}]  }
   0x1   :  { %s19_s23 = sshll.u32 %s2845_s0, 4  ;;  %s20_s23 = int_to_ptr.vmem [resolvable:$true] %s19_s23 }
   0x2   :  { %22 = dma.vmem_to_smem %s20_s23, 16, %s2460_s24, [#allocation2] }
   0x3   :  { %2454 = dma.done.wait [#allocation2], 16 }
   0x4   :  { %2455 = vsyncadd [#allocation2], 4294967280 }
   0x5   :  { %25 = sfence }
   0x6   :  { %s2531_s25 = smov 0  }
   0x7 LB: > { %s2537_s26 = sadd.s32 4294967295, %s2458_s25   ;;  %p1940_p0 = scmp.ge.s32.totalorder %s2458_s25, 1  ;;  %s2458_s25 = sphi %s2531_s25, %s31_s25  }
   0x8   : > { %p462_p1 = scmp.lt.s32.totalorder %s2458_s25, 5 }
   0xa   : > { %p463_p2 = pnand %p1940_p0, %p462_p1 }
   0xb   : > { %s559_s0 = sld [smem:[#allocation3 + %s2537_s26]] (!%p463_p2)  ;;  %p550_p3 = scmp.lt.s32.totalorder (!%p463_p2), %s2537_s26, 3 }
   0xc   : > { %466 = sbr.rel (%p463_p2) target bundleno = 805 (0x325), region = 60  ;;  %s566_s18 = sld [smem:[#allocation3 + %s2537_s26]] (!%p463_p2) }
   0xd   : > { %s578_s22 = sld [smem:[#allocation3 + %s2537_s26]] (!%p463_p2) }
   0xe   : > { %s571_s29 = sld [smem:[#allocation3 + %s2537_s26]] (!%p463_p2) }
   0xf   : > { %s589_s24 = sld [smem:[#allocation3 + %s2537_s26]] (!%p463_p2) }
  0x10   : > { %s601_s19 = sld [smem:[#allocation3 + %s2537_s26]] (!%p463_p2) }
  0x11   : > { %s2544_s27 = scalar_select %p550_p3, %s2537_s26, 3  ;;  %vm1290_vm0 = vcmask 261120   ;;  %vm1331_vm1 = vcmask 1043456   ;;  %vm1749_vm2 = vcmask 123904   ;;  %vm1327_vm3 = vcmask 64512  }
  0x12   : > { %p560_p4 = scmp.lt.s32.totalorder %s559_s0, 2  ;;  %p567_p5 = scmp.lt.s32.totalorder %s566_s18, 2 }
  0x13   : > { %s2303_s28 = sshll.u32 %s2544_s27, 4  ;;  %p579_p6 = scmp.lt.s32.totalorder %s578_s22, 2 }
  0x14   : > { %s2552_s13 = scalar_lea.vmem %s2846_s1, %s2303_s28  ;;  %s2875_s0 = smov (!%p560_p4, %s559_s0), 2 }
  0x15   : > { %v617_v0 = vld [vmem:[%s2552_s13] sm:$0xff]  ;;  %s2304_s14 = sshll.u32 %s2875_s0, 9  ;;  %v618_v17 = vld [vmem:[%s2552_s13 + $0x8] sm:$0xff]  ;;  %s2877_s18 = smov (!%p567_p5, %s566_s18), 2 }
  0x16   : > { %621 = vst [vmem:[#allocation1] ss:$4 sm:$0xff] %v617_v0  ;;  %s2558_s17 = scalar_lea.vmem %s2848_s3, %s2304_s14  ;;  %s569_s21 = scalar_lea.vmem %s2849_s4, %s2877_s18 }
  0x17   : > { %v2315_v1 = vld [vmem:[%s2558_s17 + $0x38] sm:$0xff]  ;;  %v2314_v5 = vld [vmem:[%s2558_s17 + $0x30] sm:$0xff]  ;;  %v2313_v9 = vld [vmem:[%s2558_s17 + $0x28] sm:$0xff]  ;;  %623 = vst [vmem:[#allocation1 + $0x20] ss:$4 sm:$0xff] %v618_v17  ;;  %s2879_s22 = smov (!%p579_p6, %s578_s22), 2 }
  0x18   : > { %v2323_v2 = vld [vmem:[%s2558_s17 + $0x78] sm:$0xff]  ;;  %1164 = vmatpush.bf16.msra.mxu0 %v2315_v1  ;;  %v2322_v6 = vld [vmem:[%s2558_s17 + $0x70] sm:$0xff]  ;;  %v2321_v10 = vld [vmem:[%s2558_s17 + $0x68] sm:$0xff]  ;;  %s581_s0 = scalar_lea.vmem %s2851_s6, %s2879_s22  ;;  %p572_p7 = scmp.lt.s32.totalorder %s571_s29, 2 }
  0x19   : > { %v2331_v3 = vld [vmem:[%s2558_s17 + $0xb8] sm:$0xff]  ;;  %1177 = vmatpush.bf16.msra.mxu1 %v2323_v2  ;;  %v2330_v7 = vld [vmem:[%s2558_s17 + $0xb0] sm:$0xff]  ;;  %v2329_v11 = vld [vmem:[%s2558_s17 + $0xa8] sm:$0xff]  ;;  %s1943_s16 = sshll.u32 %s2544_s27, 1  ;;  %s583_s18 = sld [smem:[#allocation3 + %s2537_s26]] }
  0x1a   : > { %v2339_v4 = vld [vmem:[%s2558_s17 + $0xf8] sm:$0xff]  ;;  %1190 = vmatpush.bf16.msra.mxu2 %v2331_v3  ;;  %v2338_v8 = vld [vmem:[%s2558_s17 + $0xf0] sm:$0xff]  ;;  %v2337_v12 = vld [vmem:[%s2558_s17 + $0xe8] sm:$0xff]  ;;  %s2881_s29 = smov (!%p572_p7, %s571_s29), 2  ;;  %s558_s20 = scalar_lea.vmem %s2847_s2, %s1943_s16 }
  0x1b   : > { %1203 = vmatpush.bf16.msra.mxu3 %v2339_v4  ;;  %v2312_v13 = vld [vmem:[%s2558_s17 + $0x20] sm:$0xff]  ;;  %v2311_v18 = vld [vmem:[%s2558_s17 + $0x18] sm:$0xff]  ;;  %v2310_v22 = vld [vmem:[%s2558_s17 + $0x10] sm:$0xff]  ;;  %s2305_s30 = sshll.u32 %s2881_s29, 4  ;;  %s2461_s29 = smov 8  }
  0x1c   : > { %1165 = vmatpush.bf16.msra.mxu0 %v2314_v5  ;;  %v2320_v14 = vld [vmem:[%s2558_s17 + $0x60] sm:$0xff]  ;;  %v2319_v19 = vld [vmem:[%s2558_s17 + $0x58] sm:$0xff]  ;;  %v2318_v23 = vld [vmem:[%s2558_s17 + $0x50] sm:$0xff]  ;;  %s576_s15 = scalar_lea.vmem %s2850_s5, %s2305_s30  ;;  %s615_s23 = scalar_lea.vmem %s2857_s12, %s1943_s16 }
  0x1d   : > { %1178 = vmatpush.bf16.msra.mxu1 %v2322_v6  ;;  %v2328_v15 = vld [vmem:[%s2558_s17 + $0xa0] sm:$0xff]  ;;  %v2327_v20 = vld [vmem:[%s2558_s17 + $0x98] sm:$0xff]  ;;  %v2326_v24 = vld [vmem:[%s2558_s17 + $0x90] sm:$0xff]  ;;  %p590_p9 = scmp.lt.s32.totalorder %s589_s24, 2  ;;  %s2462_s22 = smov 120  }
  0x1e   : > { %1191 = vmatpush.bf16.msra.mxu2 %v2330_v7  ;;  %v2336_v16 = vld [vmem:[%s2558_s17 + $0xe0] sm:$0xff]  ;;  %v2335_v21 = vld [vmem:[%s2558_s17 + $0xd8] sm:$0xff]  ;;  %v2334_v25 = vld [vmem:[%s2558_s17 + $0xd0] sm:$0xff]  ;;  %p602_p11 = scmp.lt.s32.totalorder %s601_s19, 2  ;;  %s2803_s16 = scalar_lea.vmem %s2856_s11, %s2303_s28 }
  0x1f   : > { %1204 = vmatpush.bf16.msra.mxu3 %v2338_v8  ;;  %v2309_v26 = vld [vmem:[%s2558_s17 + $0x8] sm:$0xff]  ;;  %v2308_v30 = vld [vmem:[%s2558_s17] sm:$0xff]  ;;  %v2347_v34 = vld [vmem:[%s2558_s17 + $0x138] sm:$0xff]  ;;  %p584_p8 = scmp.lt.s32.totalorder %s583_s18, 2  ;;  %s2885_s24 = smov (!%p590_p9, %s589_s24), 2 }
  0x20   : > { %1166 = vmatpush.bf16.msra.mxu0 %v2313_v9  ;;  %v2317_v27 = vld [vmem:[%s2558_s17 + $0x48] sm:$0xff]  ;;  %v2316_v31 = vld [vmem:[%s2558_s17 + $0x40] sm:$0xff]  ;;  %v2355_v35 = vld [vmem:[%s2558_s17 + $0x178] sm:$0xff]  ;;  %s2889_s19 = smov (!%p602_p11, %s601_s19), 2 }
  0x21   : > { %1179 = vmatpush.bf16.msra.mxu1 %v2321_v10  ;;  %v2325_v28 = vld [vmem:[%s2558_s17 + $0x88] sm:$0xff]  ;;  %v2324_v32 = vld [vmem:[%s2558_s17 + $0x80] sm:$0xff]  ;;  %v626_v36 = vld.sshfl [vmem:[#allocation1 + $0x10] sm:$0xff pattern:$0x73625140]  ;;  %s2883_s18 = smov (!%p584_p8, %s583_s18), 2 }
  0x22   : > { %1192 = vmatpush.bf16.msra.mxu2 %v2329_v11  ;;  %v2333_v29 = vld [vmem:[%s2558_s17 + $0xc8] sm:$0xff]  ;;  %v2332_v33 = vld [vmem:[%s2558_s17 + $0xc0] sm:$0xff]  ;;  %v627_v38 = vld.sshfl [vmem:[#allocation1 + $0x18] sm:$0xff pattern:$0x73625140]  ;;  %v642_v42 = vpack.c.bf16 %v626_v36, %v626_v36 }
  0x23   : > { %1205 = vmatpush.bf16.msra.mxu3 %v2337_v12  ;;  %v624_v37 = vld.sshfl [vmem:[#allocation1] sm:$0xff pattern:$0x73625140]  ;;  %v625_v39 = vld.sshfl [vmem:[#allocation1 + $0x8] sm:$0xff pattern:$0x73625140]  ;;  %v643_v44 = vpack.c.bf16 %v627_v38, %v627_v38 }
  0x24   : > { %1167 = vmatpush.bf16.msra.mxu0 %v2312_v13  ;;  %v2363_v40 = vld [vmem:[%s2558_s17 + $0x1b8] sm:$0xff]  ;;  %v640_v43 = vpack.c.bf16 %v624_v37, %v624_v37  ;;  %v641_v45 = vpack.c.bf16 %v625_v39, %v625_v39  ;;  %v2346_v46 = vld [vmem:[%s2558_s17 + $0x130] sm:$0xff]  ;;  %v2345_v50 = vld [vmem:[%s2558_s17 + $0x128] sm:$0xff] }
  0x25   : > { %1180 = vmatpush.bf16.msra.mxu1 %v2320_v14  ;;  %v2371_v41 = vld [vmem:[%s2558_s17 + $0x1f8] sm:$0xff]  ;;  %v2354_v47 = vld [vmem:[%s2558_s17 + $0x170] sm:$0xff]  ;;  %v2353_v51 = vld [vmem:[%s2558_s17 + $0x168] sm:$0xff] }
  0x26   : > { %1193 = vmatpush.bf16.msra.mxu2 %v2328_v15  ;;  %v2362_v48 = vld [vmem:[%s2558_s17 + $0x1b0] sm:$0xff]  ;;  %v2361_v52 = vld [vmem:[%s2558_s17 + $0x1a8] sm:$0xff]  ;;  %v2344_v54 = vld [vmem:[%s2558_s17 + $0x120] sm:$0xff] }
  0x27   : > { %1206 = vmatpush.bf16.msra.mxu3 %v2336_v16  ;;  %v2370_v49 = vld [vmem:[%s2558_s17 + $0x1f0] sm:$0xff]  ;;  %v2369_v53 = vld [vmem:[%s2558_s17 + $0x1e8] sm:$0xff]  ;;  %v2352_v55 = vld [vmem:[%s2558_s17 + $0x160] sm:$0xff] }
  0x28   : > { %1168 = vmatpush.bf16.msra.mxu0 %v2311_v18  ;;  %v2360_v56 = vld [vmem:[%s2558_s17 + $0x1a0] sm:$0xff]  ;;  %v2343_v58 = vld [vmem:[%s2558_s17 + $0x118] sm:$0xff]  ;;  %v2342_v62 = vld [vmem:[%s2558_s17 + $0x110] sm:$0xff] }
  0x29   : > { %1181 = vmatpush.bf16.msra.mxu1 %v2319_v19  ;;  %v2368_v57 = vld [vmem:[%s2558_s17 + $0x1e0] sm:$0xff]  ;;  %v2351_v59 = vld [vmem:[%s2558_s17 + $0x158] sm:$0xff]  ;;  %v2350_v63 = vld [vmem:[%s2558_s17 + $0x150] sm:$0xff] }
  0x2a   : > { %1194 = vmatpush.bf16.msra.mxu2 %v2327_v20  ;;  %v2359_v60 = vld [vmem:[%s2558_s17 + $0x198] sm:$0xff]  ;;  %v2358_v0 = vld [vmem:[%s2558_s17 + $0x190] sm:$0xff]  ;;  %v2341_v2 = vld [vmem:[%s2558_s17 + $0x108] sm:$0xff] }
  0x2b   : > { %1207 = vmatpush.bf16.msra.mxu3 %v2335_v21  ;;  %v2367_v61 = vld [vmem:[%s2558_s17 + $0x1d8] sm:$0xff]  ;;  %v2366_v1 = vld [vmem:[%s2558_s17 + $0x1d0] sm:$0xff]  ;;  %v2349_v3 = vld [vmem:[%s2558_s17 + $0x148] sm:$0xff] }
  0x2c   : > { %1169 = vmatpush.bf16.msra.mxu0 %v2310_v22  ;;  %v2357_v4 = vld [vmem:[%s2558_s17 + $0x188] sm:$0xff]  ;;  %v2340_v6 = vld [vmem:[%s2558_s17 + $0x100] sm:$0xff]  ;;  %v630_v12 = vld.sshfl [vmem:[#allocation1 + $0x30] sm:$0xff pattern:$0x73625140] }
  0x2d   : > { %1182 = vmatpush.bf16.msra.mxu1 %v2318_v23  ;;  %v2365_v5 = vld [vmem:[%s2558_s17 + $0x1c8] sm:$0xff]  ;;  %v2348_v7 = vld [vmem:[%s2558_s17 + $0x140] sm:$0xff]  ;;  %v631_v13 = vld.sshfl [vmem:[#allocation1 + $0x38] sm:$0xff pattern:$0x73625140]  ;;  %v646_v16 = vpack.c.bf16 %v630_v12, %v630_v12 }
  0x2e   : > { %1195 = vmatpush.bf16.msra.mxu2 %v2326_v24  ;;  %v2356_v8 = vld [vmem:[%s2558_s17 + $0x180] sm:$0xff]  ;;  %v629_v11 = vld.sshfl [vmem:[#allocation1 + $0x28] sm:$0xff pattern:$0x73625140]  ;;  %v647_v17 = vpack.c.bf16 %v631_v13, %v631_v13 }
  0x2f   : > { %1208 = vmatpush.bf16.msra.mxu3 %v2334_v25  ;;  %v2364_v9 = vld [vmem:[%s2558_s17 + $0x1c0] sm:$0xff]  ;;  %v645_v15 = vpack.c.bf16 %v629_v11, %v629_v11  ;;  %v2373_v18 = vld [vmem:[%s576_s15 + $0x8] sm:$0xff] }
  0x30   : > { %1170 = vmatpush.bf16.msra.mxu0 %v2309_v26  ;;  %v628_v10 = vld.sshfl [vmem:[#allocation1 + $0x20] sm:$0xff pattern:$0x73625140] }
  0x31   : > { %1183 = vmatpush.bf16.msra.mxu1 %v2317_v27  ;;  %v644_v14 = vpack.c.bf16 %v628_v10, %v628_v10  ;;  %v2372_v24 = vld [vmem:[%s576_s15] sm:$0xff] }
  0x32   : > { %1196 = vmatpush.bf16.msra.mxu2 %v2325_v28  ;;  %v2401_v26 = vld [vmem:[%s569_s21] ss:$0 sm:$0xff]  ;;  %s1948_s21 = sshll.u32 %s2883_s18, 2  ;;  %s594_s18 = sld [smem:[#allocation3 + %s2537_s26]] }
  0x33   : > { %1209 = vmatpush.bf16.msra.mxu3 %v2333_v29  ;;  %v1310_v27 = vld [vmem:[%s558_s20] sm:$0x3]  ;;  %s587_s14 = scalar_lea.vmem %s2852_s7, %s1948_s21  ;;  %s1951_s20 = sshll.u32 %s2889_s19, 3 }
  0x34   : > { %1171 = vmatpush.bf16.msra.mxu0 %v2308_v30  ;;  %1312 = vrot.lane.b32.xlu0 %v1310_v27, %s2461_s29  ;;  %s592_s29 = scalar_lea.vmem %s2853_s8, %s2885_s24 }
  0x35   : > { %1184 = vmatpush.bf16.msra.mxu1 %v2316_v31 }
  0x36   : > { %1197 = vmatpush.bf16.msra.mxu2 %v2324_v32 }
  0x37   : > { %1210 = vmatpush.bf16.msra.mxu3 %v2332_v33  ;;  %1172 = vmatmul.bf16.vlgmr.msra.gmra.mxu0 %v640_v43 }
  0x38   : > { %1216 = vmatpush.bf16.msrb.mxu0 %v2347_v34  ;;  %1185 = vmatmul.bf16.vlgmr.msra.gmra.mxu1 %v641_v45  ;;  %p595_p10 = scmp.lt.s32.totalorder %s594_s18, 2 }
  0x39   : > { %1229 = vmatpush.bf16.msrb.mxu1 %v2355_v35  ;;  %1198 = vmatmul.bf16.vlgmr.msra.gmra.mxu2 %v642_v42 }
  0x3a   : > { %1242 = vmatpush.bf16.msrb.mxu2 %v2363_v40  ;;  %1211 = vmatmul.bf16.vlgmr.msra.gmra.mxu3 %v643_v44  ;;  %s2887_s18 = smov (!%p595_p10, %s594_s18), 2 }
  0x3b   : > { %1255 = vmatpush.bf16.msrb.mxu3 %v2371_v41  ;;  %s2306_s21 = sshll.u32 %s2887_s18, 7 }
  0x3c   : > { %1217 = vmatpush.bf16.msrb.mxu0 %v2346_v46 }
  0x3d   : > { %1230 = vmatpush.bf16.msrb.mxu1 %v2354_v47 }
  0x3e   : > { %1243 = vmatpush.bf16.msrb.mxu2 %v2362_v48  ;;  %v1322_v48 = vld [vmem:[%s587_s14] sm:$0xf]  ;;  %s2681_s14 = scalar_lea.vmem %s2854_s9, %s2306_s21 }
  0x3f   : > { %1256 = vmatpush.bf16.msrb.mxu3 %v2370_v49  ;;  %v1333_v49 = vsel %vm1331_vm1, %v1322_v48, 0  ;;  %v2223_v13 = vld [vmem:[%s2681_s14] sm:$0xf]  ;;  %v2279_v27 = vld [vmem:[%s2681_s14 + $0x58] sm:$0xf] }
  0x40   : > { %1218 = vmatpush.bf16.msrb.mxu0 %v2345_v50  ;;  %v2402_v50 = vld [vmem:[%s581_s0] ss:$0 sm:$0xff] }
  0x41   : > { %1231 = vmatpush.bf16.msrb.mxu1 %v2353_v51 }
  0x42   : > { %1244 = vmatpush.bf16.msrb.mxu2 %v2361_v52 }
  0x43   : > { %1257 = vmatpush.bf16.msrb.mxu3 %v2369_v53 }
  0x44   : > { %1219 = vmatpush.bf16.msrb.mxu0 %v2344_v54 }
  0x45   : > { %1232 = vmatpush.bf16.msrb.mxu1 %v2352_v55 }
  0x46   : > { %1245 = vmatpush.bf16.msrb.mxu2 %v2360_v56 }
  0x47   : > { %1258 = vmatpush.bf16.msrb.mxu3 %v2368_v57 }
  0x48   : > { %1220 = vmatpush.bf16.msrb.mxu0 %v2343_v58 }
  0x49   : > { %1233 = vmatpush.bf16.msrb.mxu1 %v2351_v59  ;;  %v2382_v59 = vld [vmem:[%s2681_s14 + $0x44] sm:$0xf] }
  0x4a   : > { %1246 = vmatpush.bf16.msrb.mxu2 %v2359_v60  ;;  %v2257_v60 = vld [vmem:[%s2681_s14 + $0x60] sm:$0xf0] }
  0x4b   : > { %1259 = vmatpush.bf16.msrb.mxu3 %v2367_v61  ;;  %v2255_v61 = vld [vmem:[%s2681_s14 + $0x40] sm:$0xf] }
  0x4c   : > { %1221 = vmatpush.bf16.msrb.mxu0 %v2342_v62  ;;  %v2260_v62 = vor.u32 %v2382_v59, %v2257_v60 }
  0x4d   : > { %1234 = vmatpush.bf16.msrb.mxu1 %v2350_v63  ;;  %v2386_v63 = vld [vmem:[%s2681_s14 + $0x5c] sm:$0xf0] }
  0x4e   : > { %1247 = vmatpush.bf16.msrb.mxu2 %v2358_v0  ;;  %v2263_v0 = vld [vmem:[%s2681_s14 + $0x48] sm:$0xf] }
  0x4f   : > { %1260 = vmatpush.bf16.msrb.mxu3 %v2366_v1  ;;  %v2387_v1 = vld [vmem:[%s2681_s14 + $0x64] sm:$0xf0] }
  0x50   : > { %1222 = vmatpush.bf16.msrb.mxu0 %v2341_v2  ;;  %v2256_v2 = vor.u32 %v2386_v63, %v2255_v61 }
  0x51   : > { %1235 = vmatpush.bf16.msrb.mxu1 %v2349_v3  ;;  %v2264_v3 = vor.u32 %v2387_v1, %v2263_v0 }
  0x52   : > { %1248 = vmatpush.bf16.msrb.mxu2 %v2357_v4  ;;  %v2383_v4 = vld [vmem:[%s2681_s14 + $0x4c] sm:$0xf] }
  0x53   : > { %1261 = vmatpush.bf16.msrb.mxu3 %v2365_v5  ;;  %v2265_v5 = vld [vmem:[%s2681_s14 + $0x68] sm:$0xf0] }
  0x54   : > { %1223 = vmatpush.bf16.msrb.mxu0 %v2340_v6  ;;  %v2374_v6 = vld [vmem:[%s2681_s14 + $0x4] sm:$0xf] }
  0x55   : > { %1236 = vmatpush.bf16.msrb.mxu1 %v2348_v7  ;;  %v2268_v7 = vor.u32 %v2383_v4, %v2265_v5 }
  0x56   : > { %1249 = vmatpush.bf16.msrb.mxu2 %v2356_v8  ;;  %v2225_v8 = vld [vmem:[%s2681_s14 + $0x20] sm:$0xf0] }
  0x57   : > { %1262 = vmatpush.bf16.msrb.mxu3 %v2364_v9  ;;  %1224 = vmatmul.bf16.vlgmr.msrb.gmra.mxu0 %v644_v14  ;;  %v2228_v9 = vor.u32 %v2374_v6, %v2225_v8  ;;  %v2378_v14 = vld [vmem:[%s2681_s14 + $0x1c] sm:$0xf0] }
  0x58   : > { %1237 = vmatmul.bf16.vlgmr.msrb.gmra.mxu1 %v645_v15  ;;  %1300 = vmatpush.bf16.msra.mxu0 %v2373_v18  ;;  %v2231_v15 = vld [vmem:[%s2681_s14 + $0x8] sm:$0xf]  ;;  %v2375_v18 = vld [vmem:[%s2681_s14 + $0xc] sm:$0xf] }
  0x59   : > { %1250 = vmatmul.bf16.vlgmr.msrb.gmra.mxu2 %v646_v16  ;;  %1342 = vmatpush.bf16.msra.mxu1 %v1333_v49  ;;  %v2224_v16 = vor.u32 %v2378_v14, %v2223_v13 }
  0x5a   : > { %1263 = vmatmul.bf16.vlgmr.msrb.gmra.mxu3 %v647_v17  ;;  %1473 = vmatpush.bf16.msra.mxu2 %v2256_v2  ;;  %v2379_v17 = vld [vmem:[%s2681_s14 + $0x24] sm:$0xf0] }
  0x5b   : > { %1486 = vmatpush.bf16.msra.mxu3 %v2260_v62 }
  0x5c   : > { %1301 = vmatpush.bf16.msra.mxu0 %v2372_v24  ;;  %v2271_v24 = vld [vmem:[%s2681_s14 + $0x50] sm:$0xf] }
  0x5d   : > { %1512 = vmatpush.bf16.msrb.mxu1 %v2268_v7 }
  0x5e   : > { %1474 = vmatpush.bf16.msra.mxu2 %v2224_v16 }
  0x5f   : > { %1487 = vmatpush.bf16.msra.mxu3 %v2228_v9 }
  0x60   : > { %1499 = vmatpush.bf16.msrb.mxu0 %v2264_v3 }
  0xa6   : > { %v1313_v56 = vpop.permute.xlu0 %1312 }
  0xb4   : > { %v1173_v19 = vpop.f32.mrf.mxu0 }
  0xb5   : > { %v1186_v20 = vpop.f32.mrf.mxu1  ;;  %v1174_v30 = vadd.f32 %v2401_v26, %v1173_v19  ;;  %v2233_v19 = vld [vmem:[%s2681_s14 + $0x28] sm:$0xf0]  ;;  %v2388_v26 = vld [vmem:[%s2681_s14 + $0x6c] sm:$0xf0] }
  0xb7   : > { %v1187_v31 = vadd.f32 %v1186_v20, %v1174_v30  ;;  %v2232_v20 = vor.u32 %v2379_v17, %v2231_v15 }
  0xb9   : > { %1500 = vmatpush.bf16.msrb.mxu0 %v2232_v20 }
  0xbc   : > { %v1199_v21 = vpop.f32.mrf.mxu2  ;;  %v1175_v23 = vpop.f32.mrf.mxu0 }
  0xbd   : > { %v1212_v22 = vpop.f32.mrf.mxu3  ;;  %v1188_v25 = vpop.f32.mrf.mxu1  ;;  %v1200_v32 = vadd.f32 %v1199_v21, %v1187_v31  ;;  %v2236_v21 = vor.u32 %v2375_v18, %v2233_v19  ;;  %v2273_v23 = vld [vmem:[%s2681_s14 + $0x70] sm:$0xf0]  ;;  %v2385_v31 = vld [vmem:[%s2681_s14 + $0x5c] sm:$0xf] }
  0xbf   : > { %v1213_v33 = vadd.f32 %v1212_v22, %v1200_v32  ;;  %1513 = vmatpush.bf16.msrb.mxu1 %v2236_v21  ;;  %v2384_v22 = vld [vmem:[%s2681_s14 + $0x54] sm:$0xf]  ;;  %v2281_v32 = vld [vmem:[%s2681_s14 + $0x78] sm:$0xf0] }
  0xc0   : > { %v2276_v25 = vor.u32 %v2384_v22, %v2273_v23 }
  0xc2   : > { %1538 = vmatpush.bf16.msrb.mxu3 %v2276_v25 }
  0xc4   : > { %v1201_v28 = vpop.f32.mrf.mxu2 }
  0xc5   : > { %v1214_v29 = vpop.f32.mrf.mxu3  ;;  %v2389_v28 = vld [vmem:[%s2681_s14 + $0x74] sm:$0xf0] }
  0xc6   : > { %v2272_v29 = vor.u32 %v2388_v26, %v2271_v24  ;;  %v2280_v30 = vor.u32 %v2389_v28, %v2279_v27 }
  0xc8   : > { %1525 = vmatpush.bf16.msrb.mxu2 %v2272_v29 }
  0xd4   : > { %v1225_v34 = vpop.f32.mrf.mxu0 }
  0xd5   : > { %v1238_v35 = vpop.f32.mrf.mxu1  ;;  %v1226_v36 = vadd.f32 %v1225_v34, %v1213_v33  ;;  %v2376_v33 = vld [vmem:[%s2681_s14 + $0x14] sm:$0xf]  ;;  %v2284_v34 = vor.u32 %v2385_v31, %v2281_v32 }
  0xd7   : > { %v1239_v37 = vadd.f32 %v1238_v35, %v1226_v36  ;;  %v2241_v35 = vld [vmem:[%s2681_s14 + $0x30] sm:$0xf0]  ;;  %v2239_v36 = vld [vmem:[%s2681_s14 + $0x10] sm:$0xf] }
  0xdc   : > { %v1251_v38 = vpop.f32.mrf.mxu2  ;;  %v1227_v41 = vpop.f32.mrf.mxu0 }
  0xdd   : > { %v1264_v39 = vpop.f32.mrf.mxu3  ;;  %v1252_v40 = vadd.f32 %v1251_v38, %v1239_v37  ;;  %v1240_v42 = vpop.f32.mrf.mxu1  ;;  %v2380_v37 = vld [vmem:[%s2681_s14 + $0x2c] sm:$0xf0]  ;;  %v2244_v38 = vor.u32 %v2376_v33, %v2241_v35  ;;  %v2381_v41 = vld [vmem:[%s2681_s14 + $0x34] sm:$0xf0] }
  0xde   : > { %v2377_v42 = vld [vmem:[%s2681_s14 + $0x1c] sm:$0xf] }
  0xdf   : > { %v1265_v43 = vadd.f32 %v1264_v39, %v1252_v40  ;;  %v2240_v39 = vor.u32 %v2380_v37, %v2239_v36  ;;  %v2247_v40 = vld [vmem:[%s2681_s14 + $0x18] sm:$0xf]  ;;  %1539 = vmatpush.bf16.msrb.mxu3 %v2244_v38 }
  0xe1   : > { %v1268_v44 = vmax.f32 %v1265_v43, 0.0  ;;  %v2248_v43 = vor.u32 %v2381_v41, %v2247_v40  ;;  %1526 = vmatpush.bf16.msrb.mxu2 %v2240_v39 }
  0xe3   : > { %v1269_v45 = vpack.c.bf16 %v1268_v44, %v1268_v44  ;;  %v2249_v44 = vld [vmem:[%s2681_s14 + $0x38] sm:$0xf0] }
  0xe4   : > { %v1253_v46 = vpop.f32.mrf.mxu2 }
  0xe5   : > { %v1266_v47 = vpop.f32.mrf.mxu3  ;;  %2219 = vmatmul.msk.bf16.vlgmr.msra.gmra.mxu0 %vm1290_vm0, %v1269_v45  ;;  %v2252_v45 = vor.u32 %v2377_v42, %v2249_v44  ;;  %v2403_v46 = vld [vmem:[%s592_s29] ss:$0 sm:$0xff] }
  0xe6   : > { %1551 = vmatpush.bf16.msra.mxu0 %v2280_v30 }
  0xea   : > { %1552 = vmatpush.bf16.msra.mxu0 %v2248_v43 }
 0x162   : > { %v1303_v51 = vpop.f32.mrf.mxu0 }
 0x163   : > { %v1304_v52 = vadd.f32 %v2402_v50, %v1303_v51 }
 0x165   : > { %v1307_v53 = vmul.f32 0.5, %v1304_v52  ;;  %1750 = vst.msk [vmem:[%s615_s23] sm:$0x3] %vm1749_vm2, %v1304_v52  ;;  %vm1739_vm2 = vcmask 1045508  }
 0x167   : > { %v1308_v54 = vmul.f32 1.442695, %v1307_v53 }
 0x169   : > { %2404 = vpow2.f32 %v1308_v54 }
 0x16a   : > { %v1305_v55 = vpop.f32.mrf.mxu0 }
 0x16f   : > { %v2405_v57 = vpop.eup %2404 }
 0x170   : > { %v1315_v58 = vmul.f32 %v2405_v57, %v1313_v56 }
 0x172   : > { %1317 = vrot.lane.b32.xlu0 %v1315_v58, %s2462_s22  ;;  %s605_s22 = scalar_lea.vmem %s2855_s10, %s1951_s20 }
 0x1e4   : > { %v1318_v10 = vpop.permute.xlu0 %1317 }
 0x1e5   : > { %v1320_v11 = vadd.f32 %v1318_v10, %v1304_v52  ;;  %v2732_v52 = vld [vmem:[%s605_s22] sm:$0xff] }
 0x1e6   : > { %v1370_v53 = vperm.slane %v2732_v52, 2  ;;  %v1371_v54 = vperm.slane %v2732_v52, 3  ;;  %v1368_v59 = vperm.slane %v2732_v52, 0  ;;  %v1369_v60 = vperm.slane %v2732_v52, 1 }
 0x1e7   : > { %v1321_v12 = vpack.c.bf16 %v1320_v11, %v1320_v11  ;;  %v1374_v13 = vperm.slane %v2732_v52, 6  ;;  %v1375_v14 = vperm.slane %v2732_v52, 7  ;;  %v1372_v23 = vperm.slane %v2732_v52, 4 }
 0x1e8   : > { %v1373_v27 = vperm.slane %v2732_v52, 5 }
 0x1e9   : > { %2220 = vmatmul.msk.bf16.vlgmr.msra.gmra.mxu1 %vm1327_vm3, %v1321_v12 }
 0x1ea   : > { %1564 = vmatpush.bf16.msra.mxu1 %v2284_v34 }
 0x1ee   : > { %1565 = vmatpush.bf16.msra.mxu1 %v2252_v45 }
 0x266   : > { %v1344_v47 = vpop.f32.mrf.mxu1 }
 0x267   : > { %v1345_v48 = vadd.f32 %v2403_v46, %v1344_v47 }
 0x269   : > { %v1348_v49 = vmax.f32 %v1345_v48, 0.0 }
 0x26b   : > { %v1349_v50 = vpack.c.bf16 %v1348_v49, %v1348_v49 }
 0x26d   : > { %2285 = vmatmul.msk.bf16.vlgmr.msra.gmra.mxu2 %vm1290_vm0, %v1349_v50  ;;  %2286 = vmatmul.msk.bf16.vlgmr.msra.gmra.mxu3 %vm1290_vm0, %v1349_v50 }
 0x26e   : > { %2287 = vmatmul.msk.bf16.vlgmr.msrb.gmra.mxu0 %vm1290_vm0, %v1349_v50  ;;  %2288 = vmatmul.msk.bf16.vlgmr.msrb.gmra.mxu1 %vm1290_vm0, %v1349_v50  ;;  %v1346_v51 = vpop.f32.mrf.mxu1 }
 0x27d   : > { %2289 = vmatmul.msk.bf16.vlgmr.msrb.gmra.mxu2 %vm1290_vm0, %v1349_v50  ;;  %2290 = vmatmul.msk.bf16.vlgmr.msrb.gmra.mxu3 %vm1290_vm0, %v1349_v50 }
 0x27e   : > { %2291 = vmatmul.msk.bf16.vlgmr.msra.gmra.mxu0 %vm1290_vm0, %v1349_v50  ;;  %2292 = vmatmul.msk.bf16.vlgmr.msra.gmra.mxu1 %vm1290_vm0, %v1349_v50 }
 0x2eb   : > { %v1502_v55 = vpop.f32.mrf.mxu0  ;;  %v1515_v56 = vpop.f32.mrf.mxu1 }
 0x2ec   : > { %v1503_v57 = vadd.f32 %v1502_v55, %v1370_v53  ;;  %v1516_v58 = vadd.f32 %v1515_v56, %v1371_v54 }
 0x2ee   : > { %v2295_v61 = vmul.f32 -1.442695, %v1503_v57  ;;  %v2296_v62 = vmul.f32 -1.442695, %v1516_v58 }
 0x2f0   : > { %2406 = vpow2.f32 %v2295_v61  ;;  %v1476_v63 = vpop.f32.mrf.mxu2  ;;  %v1489_v0 = vpop.f32.mrf.mxu3 }
 0x2f1   : > { %2408 = vpow2.f32 %v2296_v62  ;;  %v1477_v1 = vadd.f32 %v1476_v63, %v1368_v59  ;;  %v1490_v2 = vadd.f32 %v1489_v0, %v1369_v60 }
 0x2f3   : > { %v2293_v3 = vmul.f32 -1.442695, %v1477_v1  ;;  %v2294_v4 = vmul.f32 -1.442695, %v1490_v2  ;;  %v1504_v5 = vpop.f32.mrf.mxu0  ;;  %v1517_v6 = vpop.f32.mrf.mxu1 }
 0x2f5   : > { %2410 = vpow2.f32 %v2293_v3 }
 0x2f6   : > { %v2407_v7 = vpop.eup %2406  ;;  %2412 = vpow2.f32 %v2294_v4 }
 0x2f7   : > { %v2409_v8 = vpop.eup %2408  ;;  %v1597_v9 = vadd.f32 1.0, %v2407_v7 }
 0x2f8   : > { %v1598_v10 = vadd.f32 1.0, %v2409_v8  ;;  %v1478_v11 = vpop.f32.mrf.mxu2  ;;  %v1491_v12 = vpop.f32.mrf.mxu3 }
 0x2f9   : > { %2414 = vrcp.f32 %v1597_v9  ;;  %v1642_v25 = vand.u32 2147483647, %v1597_v9  ;;  %v1644_v26 = vand.u32 2147483648, %v1597_v9  ;;  %vm1638_vm4 = vweird.f32 %v1597_v9 }
 0x2fa   : > { %2416 = vrcp.f32 %v1598_v10  ;;  %vm1653_vm5 = vweird.f32 %v1598_v10  ;;  %v1657_v33 = vand.u32 2147483647, %v1598_v10  ;;  %v1659_v34 = vand.u32 2147483648, %v1598_v10 }
 0x2fb   : > { %v2411_v15 = vpop.eup %2410  ;;  %v1554_v16 = vpop.f32.mrf.mxu0  ;;  %vm2748_vm6 = vcmp.eq.f32.partialorder %v1642_v25, 8.507059e+37  ;;  %v1645_v40 = vor.u32 1.1754944e-38, %v1644_v26 }
 0x2fc   : > { %v1567_v17 = vpop.f32.mrf.mxu1  ;;  %v2413_v18 = vpop.eup %2412  ;;  %v2740_v19 = vadd.f32 1.0, %v2411_v15  ;;  %v1555_v21 = vadd.f32 %v1554_v16, %v1374_v13  ;;  %vm2756_vm9 = vcmp.eq.f32.partialorder %v1657_v33, 8.507059e+37  ;;  %v1660_v53 = vor.u32 1.1754944e-38, %v1659_v34 }
 0x2fd   : > { %v2742_v20 = vadd.f32 1.0, %v2413_v18  ;;  %v1568_v22 = vadd.f32 %v1567_v17, %v1375_v14 }
 0x2fe   : > { %2418 = vrcp.f32 %v2740_v19  ;;  %v2299_v36 = vmul.f32 -1.442695, %v1555_v21  ;;  %vm1608_vm13 = vweird.f32 %v2740_v19  ;;  %v1614_v5 = vand.u32 2147483648, %v2740_v19 }
 0x2ff   : > { %v2415_v24 = vpop.eup %2414  ;;  %2420 = vrcp.f32 %v2742_v20  ;;  %v2300_v37 = vmul.f32 -1.442695, %v1568_v22  ;;  %v1627_v58 = vand.u32 2147483647, %v2742_v20  ;;  %v1629_v63 = vand.u32 2147483648, %v2742_v20 }
 0x300   : > { %v2417_v28 = vpop.eup %2416  ;;  %v1634_v29 = vmul.f32 %v2415_v24, %v1597_v9  ;;  %v1528_v30 = vpop.f32.mrf.mxu2  ;;  %vm1639_vm7 = vweird.f32 %v2415_v24  ;;  %2422 = vpow2.f32 %v2299_v36  ;;  %v1612_v13 = vand.u32 2147483647, %v2740_v19 }
 0x301   : > { %v1541_v31 = vpop.f32.mrf.mxu3  ;;  %v1649_v32 = vmul.f32 %v2417_v28, %v1598_v10  ;;  %v1529_v38 = vadd.f32 %v1528_v30, %v1372_v23  ;;  %vm1654_vm8 = vweird.f32 %v2417_v28  ;;  %2424 = vpow2.f32 %v2300_v37  ;;  %vm2762_vm10 = vmor %vm1638_vm4, %vm1639_vm7 }
 0x302   : > { %v1635_v35 = vsub.f32 1.0, %v1634_v29  ;;  %v1542_v42 = vadd.f32 %v1541_v31, %v1373_v27  ;;  %vm2770_vm11 = vmor %vm1653_vm5, %vm1654_vm8  ;;  %vm1623_vm0 = vweird.f32 %v2742_v20  ;;  %vm1628_vm4 = vcmp.eq.f32.partialorder %v1627_v58, 8.507059e+37 }
 0x303   : > { %v1650_v41 = vsub.f32 1.0, %v1649_v32  ;;  %v1556_v43 = vpop.f32.mrf.mxu0  ;;  %v2297_v47 = vmul.f32 -1.442695, %v1529_v38  ;;  %v1630_v16 = vor.u32 1.1754944e-38, %v1629_v63  ;;  %vm1737_vm5 = vcmask 1041408  }
 0x304   : > { %v1569_v44 = vpop.f32.mrf.mxu1  ;;  %v2752_v45 = vpop.eup %2418  ;;  %v1636_v46 = vmul.f32 %v2415_v24, %v1635_v35  ;;  %v2298_v59 = vmul.f32 -1.442695, %v1542_v42 }
 0x305   : > { %v2421_v48 = vpop.eup %2420  ;;  %v1651_v49 = vmul.f32 %v2417_v28, %v1650_v41  ;;  %v1604_v50 = vmul.f32 %v2752_v45, %v2740_v19  ;;  %2426 = vpow2.f32 %v2297_v47  ;;  %vm1609_vm12 = vweird.f32 %v2752_v45 }
 0x306   : > { %v1637_v51 = vadd.f32 %v2415_v24, %v1636_v46  ;;  %v1619_v54 = vmul.f32 %v2421_v48, %v2742_v20  ;;  %2428 = vpow2.f32 %v2298_v59  ;;  %v2423_v4 = vpop.eup %2422  ;;  %vm1624_vm14 = vweird.f32 %v2421_v48  ;;  %vm2786_vm15 = vmor %vm1608_vm13, %vm1609_vm12 }
 0x307   : > { %v1652_v56 = vadd.f32 %v2417_v28, %v1651_v49  ;;  %v1605_v57 = vsub.f32 1.0, %v1604_v50  ;;  %v2425_v7 = vpop.eup %2424  ;;  %v1601_v11 = vadd.f32 1.0, %v2423_v4  ;;  %vm1625_vm3 = vmor %vm1623_vm0, %vm1624_vm14 }
 0x308   : > { %v1641_v60 = vsel %vm2762_vm10, %v2415_v24, %v1637_v51  ;;  %v1620_v62 = vsub.f32 1.0, %v1619_v54  ;;  %v1530_v0 = vpop.f32.mrf.mxu2  ;;  %v2792_v15 = vadd.f32 1.0, %v2425_v7  ;;  %v1615_v24 = vor.u32 1.1754944e-38, %v1614_v5 }
 0x309   : > { %v1543_v1 = vpop.f32.mrf.mxu3  ;;  %v1656_v2 = vsel %vm2770_vm11, %v2417_v28, %v1652_v56  ;;  %v1606_v3 = vmul.f32 %v2752_v45, %v1605_v57  ;;  %v1646_v8 = vsel %vm2748_vm6, %v1645_v40, %v1641_v60  ;;  %2430 = vrcp.f32 %v1601_v11 }
 0x30a   : > { %v1621_v6 = vmul.f32 %v2421_v48, %v1620_v62  ;;  %v1661_v9 = vsel %vm2756_vm9, %v1660_v53, %v1656_v2  ;;  %v1732_v18 = vrot.slane %v1646_v8, 4  ;;  %2432 = vrcp.f32 %v2792_v15 }
 0x30b   : > { %v1607_v10 = vadd.f32 %v2752_v45, %v1606_v3  ;;  %v2427_v17 = vpop.eup %2426  ;;  %v1733_v21 = vrot.slane %v1661_v9, 2  ;;  %vm1613_vm6 = vcmp.eq.f32.partialorder %v1612_v13, 8.507059e+37  ;;  %v1702_v38 = vand.u32 2147483647, %v1601_v11 }
 0x30c   : > { %v1622_v14 = vadd.f32 %v2421_v48, %v1621_v6  ;;  %v2429_v19 = vpop.eup %2428  ;;  %v2805_v27 = vadd.f32 1.0, %v2427_v17  ;;  %v1704_v39 = vand.u32 2147483648, %v1601_v11  ;;  %v1719_v42 = vand.u32 2147483648, %v2792_v15 }
 0x30d   : > { %v1611_v22 = vsel %vm2786_vm15, %v2752_v45, %v1607_v10  ;;  %v1600_v28 = vadd.f32 1.0, %v2429_v19  ;;  %v1740_v29 = vsel %vm1739_vm2, %v1732_v18, %v1733_v21  ;;  %vm1698_vm9 = vweird.f32 %v1601_v11 }
 0x30e   : > { %v1626_v23 = vsel %vm1625_vm3, %v2421_v48, %v1622_v14  ;;  %v1616_v26 = vsel %vm1613_vm6, %v1615_v24, %v1611_v22  ;;  %2434 = vrcp.f32 %v2805_v27  ;;  %vm1713_vm10 = vweird.f32 %v2792_v15 }
 0x30f   : > { %v1631_v25 = vsel %vm1628_vm4, %v1630_v16, %v1626_v23  ;;  %v2431_v31 = vpop.eup %2430  ;;  %2436 = vrcp.f32 %v1600_v28  ;;  %v1717_v47 = vand.u32 2147483647, %v2792_v15  ;;  %vm2821_vm12 = vcmp.eq.f32.partialorder %v1702_v38, 8.507059e+37 }
 0x310   : > { %v1731_v20 = vrot.slane %v1631_v25, 6  ;;  %v1694_v33 = vmul.f32 %v2431_v31, %v1601_v11  ;;  %v2433_v34 = vpop.eup %2432  ;;  %vm1699_vm7 = vweird.f32 %v2431_v31  ;;  %v1705_v51 = vor.u32 1.1754944e-38, %v1704_v39 }
 0x311   : > { %v1709_v36 = vmul.f32 %v2433_v34, %v2792_v15  ;;  %vm1714_vm8 = vweird.f32 %v2433_v34  ;;  %vm2817_vm11 = vmor %vm1698_vm9, %vm1699_vm7  ;;  %v1720_v55 = vor.u32 1.1754944e-38, %v1719_v42  ;;  %v1687_v57 = vand.u32 2147483647, %v1600_v28 }
 0x312   : > { %v1738_v30 = vsel %vm1737_vm5, %v1616_v26, %v1731_v20  ;;  %v1695_v35 = vsub.f32 1.0, %v1694_v33  ;;  %vm1715_vm13 = vmor %vm1713_vm10, %vm1714_vm8  ;;  %v1689_v60 = vand.u32 2147483648, %v1600_v28  ;;  %vm1718_vm15 = vcmp.eq.f32.partialorder %v1717_v47, 8.507059e+37 }
 0x313   : > { %v1741_v32 = vsel %vm1331_vm1, %v1738_v30, %v1740_v29  ;;  %v1710_v40 = vsub.f32 1.0, %v1709_v36  ;;  %vm1668_vm0 = vweird.f32 %v2805_v27  ;;  %v1674_v1 = vand.u32 2147483648, %v2805_v27 }
 0x314   : > { %1747 = vst [vmem:[%s2803_s16] sm:$0xff] %v1741_v32  ;;  %v1696_v37 = vmul.f32 %v2431_v31, %v1695_v35  ;;  %v2435_v41 = vpop.eup %2434  ;;  %v1672_v3 = vand.u32 2147483647, %v2805_v27  ;;  %vm1683_vm6 = vweird.f32 %v1600_v28  ;;  %vm1688_vm8 = vcmp.eq.f32.partialorder %v1687_v57, 8.507059e+37 }
 0x315   : > { %v2437_v43 = vpop.eup %2436  ;;  %v1711_v45 = vmul.f32 %v2433_v34, %v1710_v40  ;;  %v1664_v46 = vmul.f32 %v2435_v41, %v2805_v27  ;;  %vm1669_vm14 = vweird.f32 %v2435_v41  ;;  %v1690_v5 = vor.u32 1.1754944e-38, %v1689_v60 }
 0x316   : > { %v1697_v44 = vadd.f32 %v2431_v31, %v1696_v37  ;;  %v1679_v48 = vmul.f32 %v2437_v43, %v1600_v28  ;;  %vm1684_vm3 = vweird.f32 %v2437_v43  ;;  %vm2831_vm4 = vmor %vm1668_vm0, %vm1669_vm14  ;;  %v1675_v10 = vor.u32 1.1754944e-38, %v1674_v1 }
 0x317   : > { %v1712_v52 = vadd.f32 %v2433_v34, %v1711_v45  ;;  %v1665_v53 = vsub.f32 1.0, %v1664_v46  ;;  %vm1685_vm7 = vmor %vm1683_vm6, %vm1684_vm3  ;;  %vm1673_vm9 = vcmp.eq.f32.partialorder %v1672_v3, 8.507059e+37 }
 0x318   : > { %v1701_v54 = vsel %vm2817_vm11, %v2431_v31, %v1697_v44  ;;  %v1680_v56 = vsub.f32 1.0, %v1679_v48 }
 0x319   : > { %v1716_v58 = vsel %vm1715_vm13, %v2433_v34, %v1712_v52  ;;  %v1666_v59 = vmul.f32 %v2435_v41, %v1665_v53  ;;  %v1706_v62 = vsel %vm2821_vm12, %v1705_v51, %v1701_v54 }
 0x31a   : > { %v1681_v61 = vmul.f32 %v2437_v43, %v1680_v56  ;;  %v1721_v63 = vsel %vm1718_vm15, %v1720_v55, %v1716_v58  ;;  %v1735_v6 = vrot.slane %v1706_v62, 4 }
 0x31b   : > { %v1667_v0 = vadd.f32 %v2435_v41, %v1666_v59  ;;  %v1736_v7 = vrot.slane %v1721_v63, 2 }
 0x31c   : > { %v1682_v4 = vadd.f32 %v2437_v43, %v1681_v61 }
 0x31d   : > { %v1671_v8 = vsel %vm2831_vm4, %v2435_v41, %v1667_v0  ;;  %v1743_v14 = vsel %vm1739_vm2, %v1735_v6, %v1736_v7 }
 0x31e   : > { %v1686_v9 = vsel %vm1685_vm7, %v2437_v43, %v1682_v4  ;;  %v1676_v13 = vsel %vm1673_vm9, %v1675_v10, %v1671_v8 }
 0x31f   : > { %v1691_v11 = vsel %vm1688_vm8, %v1690_v5, %v1686_v9 }
 0x320   : > { %v1734_v12 = vrot.slane %v1691_v11, 6 }
 0x322   : > { %v1742_v15 = vsel %vm1737_vm5, %v1676_v13, %v1734_v12 }
 0x323   : > { %v1744_v16 = vsel %vm1331_vm1, %v1742_v15, %v1743_v14 }
 0x324   : > { %1748 = vst [vmem:[%s2803_s16 + $0x8] sm:$0xff] %v1744_v16 }
 0x325 PF: > { %s31_s25 = sadd.s32 1, %s2458_s25  }
 0x326   : > { %p28_p12 = scmp.ge.s32.totalorder %s31_s25, 6  }
 0x328   :  { %30 = sbr.rel (!%p28_p12) target bundleno = 7 (0x7), region = 130 }

</bundles_post_ra>
